<compile_context>
chip_gen: v7x
topology: tpu7x:2x2x1
jax: 0.10.0
libtpu: 0.0.40
codegen_flags: <defaults>
</compile_context>

<pallas_src>
import functools

import jax
import jax.numpy as jnp
from jax.experimental import pallas as pl
from jax.experimental.pallas import tpu as pltpu


def _layer_norm(x, gamma, beta, eps=1e-5):
    mu = jnp.mean(x, axis=-1, keepdims=True)
    var = jnp.mean((x - mu) ** 2, axis=-1, keepdims=True)
    return (x - mu) * jax.lax.rsqrt(var + eps) * gamma + beta


def _gelu(x):
    # TODO(synk): PyTorch nn.GELU() default is the exact erf form; erf may not
    # lower in Mosaic, so the tanh approximation is used (diff ~1e-3).  The tanh
    # itself is evaluated in bf16 (EUP bf16 on v6e/v7x); drop the casts for
    # tighter parity.
    c = 0.7978845608028654  # sqrt(2/pi)
    t = jnp.tanh((c * (x + 0.044715 * x * x * x)).astype(jnp.bfloat16))
    return 0.5 * x * (1.0 + t.astype(jnp.float32))


def _blocks_kernel(x_ref, g1_ref, b1_ref, wqkv_ref, wo_ref, bo_ref,
                   g2_ref, b2_ref, w1_ref, bf1_ref, w2_ref, bf2_ref,
                   o_ref, xn2_ref, *, heads, dim_head, scale, kv_block):
    """One (batch, layer, mlp-tile) grid step.

    The output block index depends only on b, so the activation lives in VMEM
    across the whole (depth, mlp_tiles) sub-grid and is the layer-to-layer
    carry.  Attention runs on mlp-tile 0 of each layer; every mlp-tile step
    adds one chunk of the FFN into the resident activation.
    """
    layer = pl.program_id(1)
    mt = pl.program_id(2)
    n_mlp_tiles = pl.num_programs(2)

    # Seed the resident activation with the input on the very first step.
    @pl.when(jnp.logical_and(layer == 0, mt == 0))
    def _():
        o_ref[...] = x_ref[...]

    # ---------- PreNorm + Attention (once per layer, on mlp tile 0) ----------
    @pl.when(mt == 0)
    def _attention():
        x = o_ref[0].astype(jnp.float32)                    # (N, D) resident carry
        n = x.shape[0]
        inner = heads * dim_head

        xn = _layer_norm(x, g1_ref[0], b1_ref[0])
        qkv = jnp.dot(xn.astype(jnp.bfloat16), wqkv_ref[0],
                      preferred_element_type=jnp.float32)   # (N, 3*inner) f32

        # Scale folded into q (dh-wide) instead of the (N, N) score tensor;
        # cast to bf16 *before* the head relayout to halve XLU relayout bytes.
        # TODO(synk): a head-major batched-matmul qkv layout would remove the
        # relayout entirely at the cost of broadcasting xn to (H, N, D).
        q = (qkv[:, 0:inner] * scale).astype(jnp.bfloat16)
        k = qkv[:, inner:2 * inner].astype(jnp.bfloat16)
        v = qkv[:, 2 * inner:3 * inner].astype(jnp.bfloat16)
        q = q.reshape(n, heads, dim_head).swapaxes(0, 1)    # (H, N, dh)
        k = k.reshape(n, heads, dim_head).swapaxes(0, 1)
        v = v.reshape(n, heads, dim_head).swapaxes(0, 1)

        # Flash-style online softmax over KV tiles: scores never exceed
        # (H, N, kv_block), so VMEM stays bounded for realistic N.
        m_i = jnp.full((heads, n, 1), -jnp.inf, jnp.float32)
        l_i = jnp.zeros((heads, n, 1), jnp.float32)
        acc = jnp.zeros((heads, n, dim_head), jnp.float32)
        for t in range(n // kv_block):
            k_t = k[:, t * kv_block:(t + 1) * kv_block, :]
            v_t = v[:, t * kv_block:(t + 1) * kv_block, :]
            s = jnp.einsum('hqd,hkd->hqk', q, k_t,
                           preferred_element_type=jnp.float32)       # (H,N,kv)
            m_new = jnp.maximum(m_i, jnp.max(s, axis=-1, keepdims=True))
            alpha = jnp.exp(m_i - m_new)
            p = jnp.exp(s - m_new)
            l_i = alpha * l_i + jnp.sum(p, axis=-1, keepdims=True)
            acc = alpha * acc + jnp.einsum('hqk,hkd->hqd',
                                           p.astype(jnp.bfloat16), v_t,
                                           preferred_element_type=jnp.float32)
            m_i = m_new
        head_out = acc * pl.reciprocal(l_i, approx=True)             # (H, N, dh)

        attn_out = head_out.astype(jnp.bfloat16).swapaxes(0, 1).reshape(n, inner)
        attn_out = jnp.dot(attn_out, wo_ref[0],
                           preferred_element_type=jnp.float32) + bo_ref[0]
        x_attn = x + attn_out                                        # residual

        # Residual base for the FFN chunks + cached LayerNorm they all share.
        o_ref[0] = x_attn.astype(o_ref.dtype)
        xn2_ref[...] = _layer_norm(x_attn, g2_ref[0], b2_ref[0])

    # ---------- PreNorm + FeedForward: one mlp_dim tile per grid step --------
    xn2 = xn2_ref[...]                                               # (N, D) f32
    h = jnp.dot(xn2.astype(jnp.bfloat16), w1_ref[0],
                preferred_element_type=jnp.float32) + bf1_ref[0]     # (N, t_mlp)
    h = _gelu(h)
    ff = jnp.dot(h.astype(jnp.bfloat16), w2_ref[0],
                 preferred_element_type=jnp.float32)                 # (N, D)
    o_ref[0] = (o_ref[0].astype(jnp.float32) + ff).astype(o_ref.dtype)

    @pl.when(mt == n_mlp_tiles - 1)
    def _():
        # Second FFN bias added exactly once per layer, on the last mlp tile.
        o_ref[0] = (o_ref[0].astype(jnp.float32) + bf2_ref[0]).astype(o_ref.dtype)


def transformer_blocks(x, params, *, heads, dim_head,
                       kv_block=512, mlp_block=512):
    """Applies all `depth` transformer blocks in a single fused pallas_call."""
    B, N, D = x.shape
    depth = params['wqkv'].shape[0]
    inner = heads * dim_head
    mlp_dim = params['w1'].shape[-1]
    scale = dim_head ** -0.5

    # Static tile sizes (fall back to the full extent when it doesn't divide).
    kv_block = min(kv_block, N)
    if N % kv_block:
        kv_block = N
    t_mlp = min(mlp_block, mlp_dim)
    if mlp_dim % t_mlp:
        t_mlp = mlp_dim
    n_mlp_tiles = mlp_dim // t_mlp

    kern = functools.partial(_blocks_kernel, heads=heads, dim_head=dim_head,
                             scale=scale, kv_block=kv_block)

    operands = [
        (x,              (1, N, D),         lambda b, d, m: (b, 0, 0)),
        (params['g1'],   (1, 1, D),         lambda b, d, m: (d, 0, 0)),
        (params['b1'],   (1, 1, D),         lambda b, d, m: (d, 0, 0)),
        (params['wqkv'], (1, D, 3 * inner), lambda b, d, m: (d, 0, 0)),
        (params['wo'],   (1, inner, D),     lambda b, d, m: (d, 0, 0)),
        (params['bo'],   (1, 1, D),         lambda b, d, m: (d, 0, 0)),
        (params['g2'],   (1, 1, D),         lambda b, d, m: (d, 0, 0)),
        (params['b2'],   (1, 1, D),         lambda b, d, m: (d, 0, 0)),
        (params['w1'],   (1, D, t_mlp),     lambda b, d, m: (d, 0, m)),
        (params['bf1'],  (1, 1, t_mlp),     lambda b, d, m: (d, 0, m)),
        (params['w2'],   (1, t_mlp, D),     lambda b, d, m: (d, m, 0)),
        (params['bf2'],  (1, 1, D),         lambda b, d, m: (d, 0, 0)),
    ]
    in_specs = [pl.BlockSpec(shape, imap) for _, shape, imap in operands]
    args = [arr for arr, _, _ in operands]
    out_spec = pl.BlockSpec((1, N, D), lambda b, d, m: (b, 0, 0))

    # --- scoped-VMEM budget: double-buffered blocks + resident intermediates,
    # with headroom; capped v7x-safely (64 MiB physical). ---
    def nbytes(shape, dtype):
        size = 1
        for s in shape:
            size *= s
        return size * jnp.dtype(dtype).itemsize

    block_bytes = sum(nbytes(shape, arr.dtype) for arr, shape, _ in operands)
    block_bytes += nbytes((1, N, D), x.dtype)                      # output block
    scratch_bytes = nbytes((N, D), jnp.float32)
    interm_bytes = (N * 3 * inner * 4 + 3 * N * inner * 2          # qkv + q/k/v
                    + 3 * heads * N * kv_block * 4                 # score tile+exp
                    + heads * N * dim_head * 4                     # flash acc
                    + 2 * N * t_mlp * 4 + 4 * N * D * 4)           # ffn chunk etc.
    est = 2 * block_bytes + scratch_bytes + interm_bytes
    try:
        vmem_cap = pltpu.get_tpu_info().vmem_capacity_bytes
    except Exception:
        vmem_cap = 64 * 1024 * 1024
    vmem_limit = int(min(0.9 * vmem_cap, max(32 * 1024 * 1024, 1.5 * est)))

    # --- advisory cost estimate so XLA can schedule around the fused call ---
    flops_attn = (2 * N * D * 3 * inner + 4 * heads * N * N * dim_head
                  + 2 * N * inner * D)
    flops_ffn = 4 * N * D * mlp_dim
    weight_bytes = sum(int(p.size) * p.dtype.itemsize for p in params.values())
    cost = pl.CostEstimate(
        flops=int(B * depth * (flops_attn + flops_ffn)),
        transcendentals=int(B * depth * (heads * N * N + N * mlp_dim)),
        bytes_accessed=int(2 * x.size * x.dtype.itemsize + B * weight_bytes),
    )

    # TODO(synk): on v5e, amortize the per-batch weight re-fetch by blocking
    # several batch elements per activation tile (or constant weight index maps
    # when the whole depth-stacked weight set fits VMEM); kept at one batch
    # element per tile here so the "parallel" batch axis feeds both v7x cores.
    return pl.pallas_call(
        kern,
        out_shape=jax.ShapeDtypeStruct((B, N, D), x.dtype),
        grid=(B, depth, n_mlp_tiles),
        in_specs=in_specs,
        out_specs=out_spec,
        scratch_shapes=[pltpu.VMEM((N, D), jnp.float32)],
        compiler_params=pltpu.CompilerParams(
            dimension_semantics=("parallel", "arbitrary", "arbitrary"),
            vmem_limit_bytes=vmem_limit),
        cost_estimate=cost,
    )(*args)


def init_params(key, *, depth, dim, heads, dim_head, mlp_dim,
                weight_dtype=jnp.bfloat16):
    """Depth-stacked parameters.  Matmul weights in bf16, affine params in f32."""
    inner = heads * dim_head
    k0, k1, k2, k3 = jax.random.split(key, 4)
    params = dict(
        g1=jnp.ones((depth, 1, dim), jnp.float32),
        b1=jnp.zeros((depth, 1, dim), jnp.float32),
        wqkv=(0.02 * jax.random.normal(k0, (depth, dim, 3 * inner),
                                       jnp.float32)).astype(weight_dtype),
        wo=(0.02 * jax.random.normal(k1, (depth, inner, dim),
                                     jnp.float32)).astype(weight_dtype),
        bo=jnp.zeros((depth, 1, dim), jnp.float32),
        g2=jnp.ones((depth, 1, dim), jnp.float32),
        b2=jnp.zeros((depth, 1, dim), jnp.float32),
        w1=(0.02 * jax.random.normal(k2, (depth, dim, mlp_dim),
                                     jnp.float32)).astype(weight_dtype),
        bf1=jnp.zeros((depth, 1, mlp_dim), jnp.float32),
        w2=(0.02 * jax.random.normal(k3, (depth, mlp_dim, dim),
                                     jnp.float32)).astype(weight_dtype),
        bf2=jnp.zeros((depth, 1, dim), jnp.float32),
    )
    return params


if __name__ == "__main__":
    # Small config consistent with TransformerBlocks(dim, depth, heads, dim_head, mlp_dim)
    B, N = 2, 8
    dim, depth, heads, dim_head, mlp_dim = 32, 2, 4, 8, 64

    key = jax.random.PRNGKey(0)
    kx, kp = jax.random.split(key)
    x = jax.random.normal(kx, (B, N, dim), jnp.float32)
    params = init_params(kp, depth=depth, dim=dim, heads=heads,
                         dim_head=dim_head, mlp_dim=mlp_dim)

    out = transformer_blocks(x, params, heads=heads, dim_head=dim_head)
    jax.block_until_ready(out)
    assert out.shape == (B, N, dim)
    print("KERNEL_OK")
</pallas_src>

<mosaic_0001>
module attributes {stable_mosaic.version = 11 : i64} {
  func.func @_blocks_kernel(%arg0: i32, %arg1: i32, %arg2: i32, %arg3: memref<1x8x32xf32, #tpu.memory_space<vmem>>, %arg4: memref<1x1x32xf32, #tpu.memory_space<vmem>>, %arg5: memref<1x1x32xf32, #tpu.memory_space<vmem>>, %arg6: memref<1x32x96xbf16, #tpu.memory_space<vmem>>, %arg7: memref<1x32x32xbf16, #tpu.memory_space<vmem>>, %arg8: memref<1x1x32xf32, #tpu.memory_space<vmem>>, %arg9: memref<1x1x32xf32, #tpu.memory_space<vmem>>, %arg10: memref<1x1x32xf32, #tpu.memory_space<vmem>>, %arg11: memref<1x32x64xbf16, #tpu.memory_space<vmem>>, %arg12: memref<1x1x64xf32, #tpu.memory_space<vmem>>, %arg13: memref<1x64x32xbf16, #tpu.memory_space<vmem>>, %arg14: memref<1x1x32xf32, #tpu.memory_space<vmem>>, %arg15: memref<1x8x32xf32, #tpu.memory_space<vmem>>, %arg16: memref<8x32xf32, #tpu.memory_space<vmem>>) attributes {dimension_semantics = [#tpu.dimension_semantics<parallel>, #tpu.dimension_semantics<arbitrary>, #tpu.dimension_semantics<arbitrary>], iteration_bounds = array<i64: 2, 2, 1>, scalar_prefetch = 0 : i64, scratch_operands = 1 : i64, tpu.core_type = #tpu.core_type<tc>, window_params = [{transform_indices = @transform_0, window_bounds = array<i64: 1, 8, 32>}, {transform_indices = @transform_1, window_bounds = array<i64: 1, 1, 32>}, {transform_indices = @transform_2, window_bounds = array<i64: 1, 1, 32>}, {transform_indices = @transform_3, window_bounds = array<i64: 1, 32, 96>}, {transform_indices = @transform_4, window_bounds = array<i64: 1, 32, 32>}, {transform_indices = @transform_5, window_bounds = array<i64: 1, 1, 32>}, {transform_indices = @transform_6, window_bounds = array<i64: 1, 1, 32>}, {transform_indices = @transform_7, window_bounds = array<i64: 1, 1, 32>}, {transform_indices = @transform_8, window_bounds = array<i64: 1, 32, 64>}, {transform_indices = @transform_9, window_bounds = array<i64: 1, 1, 64>}, {transform_indices = @transform_10, window_bounds = array<i64: 1, 64, 32>}, {transform_indices = @transform_11, window_bounds = array<i64: 1, 1, 32>}, {transform_indices = @transform_12, window_bounds = array<i64: 1, 8, 32>}]} {
    %c0_i32 = arith.constant 0 : i32
    %0 = arith.cmpi eq, %arg1, %c0_i32 : i32
    %c0_i32_0 = arith.constant 0 : i32
    %1 = arith.cmpi eq, %arg2, %c0_i32_0 : i32
    %2 = arith.andi %0, %1 : i1
    %3 = arith.extui %2 : i1 to i32
    %c0_i32_1 = arith.constant 0 : i32
    %4 = arith.cmpi ne, %3, %c0_i32_1 : i32
    scf.if %4 {
      %c0_27 = arith.constant 0 : index
      %c0_28 = arith.constant 0 : index
      %c0_29 = arith.constant 0 : index
      %45 = vector.load %arg3[%c0_27, %c0_28, %c0_29] : memref<1x8x32xf32, #tpu.memory_space<vmem>>, vector<1x8x32xf32>
      %c0_30 = arith.constant 0 : index
      %c0_31 = arith.constant 0 : index
      %c0_32 = arith.constant 0 : index
      %46 = vector.load %arg15[%c0_30, %c0_31, %c0_32] : memref<1x8x32xf32, #tpu.memory_space<vmem>>, vector<1x8x32xf32>
      tpu.vector_store %arg15[%c0_30, %c0_31, %c0_32], %45 {strides = array<i32>} : memref<1x8x32xf32, #tpu.memory_space<vmem>>, vector<1x8x32xf32>,
    } else {
    }
    %c0_i32_2 = arith.constant 0 : i32
    %5 = arith.cmpi eq, %arg2, %c0_i32_2 : i32
    %6 = arith.extui %5 : i1 to i32
    %c0_i32_3 = arith.constant 0 : i32
    %7 = arith.cmpi ne, %6, %c0_i32_3 : i32
    scf.if %7 {
      %c0_27 = arith.constant 0 : index
      %c0_28 = arith.constant 0 : index
      %c0_29 = arith.constant 0 : index
      %45 = vector.load %arg15[%c0_27, %c0_28, %c0_29] : memref<1x8x32xf32, #tpu.memory_space<vmem>>, vector<1x8x32xf32>
      %46 = vector.shape_cast %45 : vector<1x8x32xf32> to vector<8x32xf32>
      %c0_30 = arith.constant 0 : index
      %c0_31 = arith.constant 0 : index
      %c0_32 = arith.constant 0 : index
      %47 = vector.load %arg4[%c0_30, %c0_31, %c0_32] : memref<1x1x32xf32, #tpu.memory_space<vmem>>, vector<1x1x32xf32>
      %48 = vector.shape_cast %47 : vector<1x1x32xf32> to vector<1x32xf32>
      %c0_33 = arith.constant 0 : index
      %c0_34 = arith.constant 0 : index
      %c0_35 = arith.constant 0 : index
      %49 = vector.load %arg5[%c0_33, %c0_34, %c0_35] : memref<1x1x32xf32, #tpu.memory_space<vmem>>, vector<1x1x32xf32>
      %50 = vector.shape_cast %49 : vector<1x1x32xf32> to vector<1x32xf32>
      %cst_36 = arith.constant dense<0.000000e+00> : vector<8xf32>
      %51 = vector.multi_reduction <add>, %46, %cst_36 [1] : vector<8x32xf32> to vector<8xf32>
      %52 = vector.shape_cast %51 : vector<8xf32> to vector<8x1xf32>
      %cst_37 = arith.constant 3.200000e+01 : f32
      %53 = vector.broadcast %cst_37 : f32 to vector<8x1xf32>
      %54 = arith.divf %52, %53 : vector<8x1xf32>
      %55 = vector.broadcast %54 : vector<8x1xf32> to vector<8x32xf32>
      %56 = arith.subf %46, %55 : vector<8x32xf32>
      %57 = arith.mulf %56, %56 : vector<8x32xf32>
      %cst_38 = arith.constant dense<0.000000e+00> : vector<8xf32>
      %58 = vector.multi_reduction <add>, %57, %cst_38 [1] : vector<8x32xf32> to vector<8xf32>
      %59 = vector.shape_cast %58 : vector<8xf32> to vector<8x1xf32>
      %cst_39 = arith.constant 3.200000e+01 : f32
      %60 = vector.broadcast %cst_39 : f32 to vector<8x1xf32>
      %61 = arith.divf %59, %60 : vector<8x1xf32>
      %62 = vector.broadcast %54 : vector<8x1xf32> to vector<8x32xf32>
      %63 = arith.subf %46, %62 : vector<8x32xf32>
      %cst_40 = arith.constant 9.99999974E-6 : f32
      %64 = vector.broadcast %cst_40 : f32 to vector<8x1xf32>
      %65 = arith.addf %61, %64 : vector<8x1xf32>
      %66 = math.rsqrt %65 : vector<8x1xf32>
      %67 = vector.broadcast %66 : vector<8x1xf32> to vector<8x32xf32>
      %68 = arith.mulf %63, %67 : vector<8x32xf32>
      %69 = vector.broadcast %48 : vector<1x32xf32> to vector<8x32xf32>
      %70 = arith.mulf %68, %69 : vector<8x32xf32>
      %71 = vector.broadcast %50 : vector<1x32xf32> to vector<8x32xf32>
      %72 = arith.addf %70, %71 : vector<8x32xf32>
      %73 = arith.truncf %72 : vector<8x32xf32> to vector<8x32xbf16>
      %c0_41 = arith.constant 0 : index
      %c0_42 = arith.constant 0 : index
      %c0_43 = arith.constant 0 : index
      %74 = vector.load %arg6[%c0_41, %c0_42, %c0_43] : memref<1x32x96xbf16, #tpu.memory_space<vmem>>, vector<1x32x96xbf16>
      %75 = vector.shape_cast %74 : vector<1x32x96xbf16> to vector<32x96xbf16>
      %cst_44 = arith.constant dense<0.000000e+00> : vector<8x96xf32>
      %76 = tpu.matmul %73, %75, %cst_44 {dimension_numbers = #tpu.dot_dimension_numbers<[1], [0], [0], [1], [0, 0, 1, 1], [], []>} : vector<8x32xbf16>, vector<32x96xbf16>, vector<8x96xf32> -> vector<8x96xf32>
      %77 = vector.extract_strided_slice %76 {offsets = [0, 0], sizes = [8, 32], strides = [1, 1]} : vector<8x96xf32> to vector<8x32xf32>
      %cst_45 = arith.constant 0.353553385 : f32
      %78 = vector.broadcast %cst_45 : f32 to vector<8x32xf32>
      %79 = arith.mulf %77, %78 : vector<8x32xf32>
      %80 = arith.truncf %79 : vector<8x32xf32> to vector<8x32xbf16>
      %81 = vector.extract_strided_slice %76 {offsets = [0, 32], sizes = [8, 32], strides = [1, 1]} : vector<8x96xf32> to vector<8x32xf32>
      %82 = arith.truncf %81 : vector<8x32xf32> to vector<8x32xbf16>
      %83 = vector.extract_strided_slice %76 {offsets = [0, 64], sizes = [8, 32], strides = [1, 1]} : vector<8x96xf32> to vector<8x32xf32>
      %84 = arith.truncf %83 : vector<8x32xf32> to vector<8x32xbf16>
      %85 = vector.shape_cast %80 : vector<8x32xbf16> to vector<8x4x8xbf16>
      %86 = tpu.transpose %85, [1, 0, 2] : vector<8x4x8xbf16> -> vector<4x8x8xbf16>
      %87 = vector.shape_cast %82 : vector<8x32xbf16> to vector<8x4x8xbf16>
      %88 = tpu.transpose %87, [1, 0, 2] : vector<8x4x8xbf16> -> vector<4x8x8xbf16>
      %89 = vector.shape_cast %84 : vector<8x32xbf16> to vector<8x4x8xbf16>
      %90 = tpu.transpose %89, [1, 0, 2] : vector<8x4x8xbf16> -> vector<4x8x8xbf16>
      %cst_46 = arith.constant 0xFF800000 : f32
      %91 = vector.broadcast %cst_46 : f32 to vector<4x8x1xf32>
      %cst_47 = arith.constant 0.000000e+00 : f32
      %92 = vector.broadcast %cst_47 : f32 to vector<4x8x1xf32>
      %cst_48 = arith.constant 0.000000e+00 : f32
      %93 = vector.broadcast %cst_48 : f32 to vector<4x8x8xf32>
      "tpu.trace_start"() <{level = 10 : i32, message = "hqd,hkd->hqk"}> : () -> ()
      %cst_49 = arith.constant dense<0.000000e+00> : vector<4x8x8xf32>
      %94 = tpu.matmul %86, %88, %cst_49 {dimension_numbers = #tpu.dot_dimension_numbers<[2], [2], [1], [1], [0, 0, 0, 1, 1, 1], [0], [0]>} : vector<4x8x8xbf16>, vector<4x8x8xbf16>, vector<4x8x8xf32> -> vector<4x8x8xf32>
      "tpu.trace_stop"() : () -> ()
      %cst_50 = arith.constant dense<0xFF800000> : vector<4x8xf32>
      %95 = vector.multi_reduction <maximumf>, %94, %cst_50 [2] : vector<4x8x8xf32> to vector<4x8xf32>
      %96 = vector.shape_cast %95 : vector<4x8xf32> to vector<4x8x1xf32>
      %97 = arith.maximumf %91, %96 : vector<4x8x1xf32>
      %98 = arith.subf %91, %97 : vector<4x8x1xf32>
      %99 = math.exp %98 : vector<4x8x1xf32>
      %100 = vector.broadcast %97 : vector<4x8x1xf32> to vector<4x8x8xf32>
      %101 = arith.subf %94, %100 : vector<4x8x8xf32>
      %102 = math.exp %101 : vector<4x8x8xf32>
      %103 = arith.mulf %99, %92 : vector<4x8x1xf32>
      %cst_51 = arith.constant dense<0.000000e+00> : vector<4x8xf32>
      %104 = vector.multi_reduction <add>, %102, %cst_51 [2] : vector<4x8x8xf32> to vector<4x8xf32>
      %105 = vector.shape_cast %104 : vector<4x8xf32> to vector<4x8x1xf32>
      %106 = arith.addf %103, %105 : vector<4x8x1xf32>
      %107 = vector.broadcast %99 : vector<4x8x1xf32> to vector<4x8x8xf32>
      %108 = arith.mulf %107, %93 : vector<4x8x8xf32>
      %109 = arith.truncf %102 : vector<4x8x8xf32> to vector<4x8x8xbf16>
      "tpu.trace_start"() <{level = 10 : i32, message = "hqk,hkd->hqd"}> : () -> ()
      %cst_52 = arith.constant dense<0.000000e+00> : vector<4x8x8xf32>
      %110 = tpu.matmul %109, %90, %cst_52 {dimension_numbers = #tpu.dot_dimension_numbers<[2], [1], [1], [2], [0, 0, 0, 1, 1, 2], [0], [0]>} : vector<4x8x8xbf16>, vector<4x8x8xbf16>, vector<4x8x8xf32> -> vector<4x8x8xf32>
      "tpu.trace_stop"() : () -> ()
      %111 = arith.addf %108, %110 : vector<4x8x8xf32>
      %112 = tpu.reciprocal %106 {approx = true} : vector<4x8x1xf32> -> vector<4x8x1xf32>
      %113 = vector.broadcast %112 : vector<4x8x1xf32> to vector<4x8x8xf32>
      %114 = arith.mulf %111, %113 : vector<4x8x8xf32>
      %115 = arith.truncf %114 : vector<4x8x8xf32> to vector<4x8x8xbf16>
      %116 = tpu.transpose %115, [1, 0, 2] : vector<4x8x8xbf16> -> vector<8x4x8xbf16>
      %117 = vector.shape_cast %116 : vector<8x4x8xbf16> to vector<8x32xbf16>
      %c0_53 = arith.constant 0 : index
      %c0_54 = arith.constant 0 : index
      %c0_55 = arith.constant 0 : index
      %118 = vector.load %arg7[%c0_53, %c0_54, %c0_55] : memref<1x32x32xbf16, #tpu.memory_space<vmem>>, vector<1x32x32xbf16>
      %119 = vector.shape_cast %118 : vector<1x32x32xbf16> to vector<32x32xbf16>
      %cst_56 = arith.constant dense<0.000000e+00> : vector<8x32xf32>
      %120 = tpu.matmul %117, %119, %cst_56 {dimension_numbers = #tpu.dot_dimension_numbers<[1], [0], [0], [1], [0, 0, 1, 1], [], []>} : vector<8x32xbf16>, vector<32x32xbf16>, vector<8x32xf32> -> vector<8x32xf32>
      %c0_57 = arith.constant 0 : index
      %c0_58 = arith.constant 0 : index
      %c0_59 = arith.constant 0 : index
      %121 = vector.load %arg8[%c0_57, %c0_58, %c0_59] : memref<1x1x32xf32, #tpu.memory_space<vmem>>, vector<1x1x32xf32>
      %122 = vector.shape_cast %121 : vector<1x1x32xf32> to vector<1x32xf32>
      %123 = vector.broadcast %122 : vector<1x32xf32> to vector<8x32xf32>
      %124 = arith.addf %120, %123 : vector<8x32xf32>
      %125 = arith.addf %46, %124 : vector<8x32xf32>
      %c0_60 = arith.constant 0 : index
      %c0_61 = arith.constant 0 : index
      %c0_62 = arith.constant 0 : index
      %126 = vector.load %arg15[%c0_60, %c0_61, %c0_62] : memref<1x8x32xf32, #tpu.memory_space<vmem>>, vector<1x8x32xf32>
      %127 = vector.shape_cast %126 : vector<1x8x32xf32> to vector<8x32xf32>
      %128 = vector.shape_cast %125 : vector<8x32xf32> to vector<1x8x32xf32>
      tpu.vector_store %arg15[%c0_60, %c0_61, %c0_62], %128 {strides = array<i32>} : memref<1x8x32xf32, #tpu.memory_space<vmem>>, vector<1x8x32xf32>,
      %c0_63 = arith.constant 0 : index
      %c0_64 = arith.constant 0 : index
      %c0_65 = arith.constant 0 : index
      %129 = vector.load %arg9[%c0_63, %c0_64, %c0_65] : memref<1x1x32xf32, #tpu.memory_space<vmem>>, vector<1x1x32xf32>
      %130 = vector.shape_cast %129 : vector<1x1x32xf32> to vector<1x32xf32>
      %c0_66 = arith.constant 0 : index
      %c0_67 = arith.constant 0 : index
      %c0_68 = arith.constant 0 : index
      %131 = vector.load %arg10[%c0_66, %c0_67, %c0_68] : memref<1x1x32xf32, #tpu.memory_space<vmem>>, vector<1x1x32xf32>
      %132 = vector.shape_cast %131 : vector<1x1x32xf32> to vector<1x32xf32>
      %cst_69 = arith.constant dense<0.000000e+00> : vector<8xf32>
      %133 = vector.multi_reduction <add>, %125, %cst_69 [1] : vector<8x32xf32> to vector<8xf32>
      %134 = vector.shape_cast %133 : vector<8xf32> to vector<8x1xf32>
      %cst_70 = arith.constant 3.200000e+01 : f32
      %135 = vector.broadcast %cst_70 : f32 to vector<8x1xf32>
      %136 = arith.divf %134, %135 : vector<8x1xf32>
      %137 = vector.broadcast %136 : vector<8x1xf32> to vector<8x32xf32>
      %138 = arith.subf %125, %137 : vector<8x32xf32>
      %139 = arith.mulf %138, %138 : vector<8x32xf32>
      %cst_71 = arith.constant dense<0.000000e+00> : vector<8xf32>
      %140 = vector.multi_reduction <add>, %139, %cst_71 [1] : vector<8x32xf32> to vector<8xf32>
      %141 = vector.shape_cast %140 : vector<8xf32> to vector<8x1xf32>
      %cst_72 = arith.constant 3.200000e+01 : f32
      %142 = vector.broadcast %cst_72 : f32 to vector<8x1xf32>
      %143 = arith.divf %141, %142 : vector<8x1xf32>
      %144 = vector.broadcast %136 : vector<8x1xf32> to vector<8x32xf32>
      %145 = arith.subf %125, %144 : vector<8x32xf32>
      %cst_73 = arith.constant 9.99999974E-6 : f32
      %146 = vector.broadcast %cst_73 : f32 to vector<8x1xf32>
      %147 = arith.addf %143, %146 : vector<8x1xf32>
      %148 = math.rsqrt %147 : vector<8x1xf32>
      %149 = vector.broadcast %148 : vector<8x1xf32> to vector<8x32xf32>
      %150 = arith.mulf %145, %149 : vector<8x32xf32>
      %151 = vector.broadcast %130 : vector<1x32xf32> to vector<8x32xf32>
      %152 = arith.mulf %150, %151 : vector<8x32xf32>
      %153 = vector.broadcast %132 : vector<1x32xf32> to vector<8x32xf32>
      %154 = arith.addf %152, %153 : vector<8x32xf32>
      %c0_74 = arith.constant 0 : index
      %c0_75 = arith.constant 0 : index
      %155 = vector.load %arg16[%c0_74, %c0_75] : memref<8x32xf32, #tpu.memory_space<vmem>>, vector<8x32xf32>
      tpu.vector_store %arg16[%c0_74, %c0_75], %154 {strides = array<i32>} : memref<8x32xf32, #tpu.memory_space<vmem>>, vector<8x32xf32>,
    } else {
    }
    %c0 = arith.constant 0 : index
    %c0_4 = arith.constant 0 : index
    %8 = vector.load %arg16[%c0, %c0_4] : memref<8x32xf32, #tpu.memory_space<vmem>>, vector<8x32xf32>
    %9 = arith.truncf %8 : vector<8x32xf32> to vector<8x32xbf16>
    %c0_5 = arith.constant 0 : index
    %c0_6 = arith.constant 0 : index
    %c0_7 = arith.constant 0 : index
    %10 = vector.load %arg11[%c0_5, %c0_6, %c0_7] : memref<1x32x64xbf16, #tpu.memory_space<vmem>>, vector<1x32x64xbf16>
    %11 = vector.shape_cast %10 : vector<1x32x64xbf16> to vector<32x64xbf16>
    %cst = arith.constant dense<0.000000e+00> : vector<8x64xf32>
    %12 = tpu.matmul %9, %11, %cst {dimension_numbers = #tpu.dot_dimension_numbers<[1], [0], [0], [1], [0, 0, 1, 1], [], []>} : vector<8x32xbf16>, vector<32x64xbf16>, vector<8x64xf32> -> vector<8x64xf32>
    %c0_8 = arith.constant 0 : index
    %c0_9 = arith.constant 0 : index
    %c0_10 = arith.constant 0 : index
    %13 = vector.load %arg12[%c0_8, %c0_9, %c0_10] : memref<1x1x64xf32, #tpu.memory_space<vmem>>, vector<1x1x64xf32>
    %14 = vector.shape_cast %13 : vector<1x1x64xf32> to vector<1x64xf32>
    %15 = vector.broadcast %14 : vector<1x64xf32> to vector<8x64xf32>
    %16 = arith.addf %12, %15 : vector<8x64xf32>
    %cst_11 = arith.constant 4.471500e-02 : f32
    %17 = vector.broadcast %cst_11 : f32 to vector<8x64xf32>
    %18 = arith.mulf %17, %16 : vector<8x64xf32>
    %19 = arith.mulf %18, %16 : vector<8x64xf32>
    %20 = arith.mulf %19, %16 : vector<8x64xf32>
    %21 = arith.addf %16, %20 : vector<8x64xf32>
    %cst_12 = arith.constant 0.797884583 : f32
    %22 = vector.broadcast %cst_12 : f32 to vector<8x64xf32>
    %23 = arith.mulf %22, %21 : vector<8x64xf32>
    %24 = arith.truncf %23 : vector<8x64xf32> to vector<8x64xbf16>
    %25 = math.tanh %24 : vector<8x64xbf16>
    %cst_13 = arith.constant 5.000000e-01 : f32
    %26 = vector.broadcast %cst_13 : f32 to vector<8x64xf32>
    %27 = arith.mulf %26, %16 : vector<8x64xf32>
    %28 = arith.extf %25 : vector<8x64xbf16> to vector<8x64xf32>
    %cst_14 = arith.constant 1.000000e+00 : f32
    %29 = vector.broadcast %cst_14 : f32 to vector<8x64xf32>
    %30 = arith.addf %29, %28 : vector<8x64xf32>
    %31 = arith.mulf %27, %30 : vector<8x64xf32>
    %32 = arith.truncf %31 : vector<8x64xf32> to vector<8x64xbf16>
    %c0_15 = arith.constant 0 : index
    %c0_16 = arith.constant 0 : index
    %c0_17 = arith.constant 0 : index
    %33 = vector.load %arg13[%c0_15, %c0_16, %c0_17] : memref<1x64x32xbf16, #tpu.memory_space<vmem>>, vector<1x64x32xbf16>
    %34 = vector.shape_cast %33 : vector<1x64x32xbf16> to vector<64x32xbf16>
    %cst_18 = arith.constant dense<0.000000e+00> : vector<8x32xf32>
    %35 = tpu.matmul %32, %34, %cst_18 {dimension_numbers = #tpu.dot_dimension_numbers<[1], [0], [0], [1], [0, 0, 1, 1], [], []>} : vector<8x64xbf16>, vector<64x32xbf16>, vector<8x32xf32> -> vector<8x32xf32>
    %c0_19 = arith.constant 0 : index
    %c0_20 = arith.constant 0 : index
    %c0_21 = arith.constant 0 : index
    %36 = vector.load %arg15[%c0_19, %c0_20, %c0_21] : memref<1x8x32xf32, #tpu.memory_space<vmem>>, vector<1x8x32xf32>
    %37 = vector.shape_cast %36 : vector<1x8x32xf32> to vector<8x32xf32>
    %38 = arith.addf %37, %35 : vector<8x32xf32>
    %c0_22 = arith.constant 0 : index
    %c0_23 = arith.constant 0 : index
    %c0_24 = arith.constant 0 : index
    %39 = vector.load %arg15[%c0_22, %c0_23, %c0_24] : memref<1x8x32xf32, #tpu.memory_space<vmem>>, vector<1x8x32xf32>
    %40 = vector.shape_cast %39 : vector<1x8x32xf32> to vector<8x32xf32>
    %41 = vector.shape_cast %38 : vector<8x32xf32> to vector<1x8x32xf32>
    tpu.vector_store %arg15[%c0_22, %c0_23, %c0_24], %41 {strides = array<i32>} : memref<1x8x32xf32, #tpu.memory_space<vmem>>, vector<1x8x32xf32>,
    %c0_i32_25 = arith.constant 0 : i32
    %42 = arith.cmpi eq, %arg2, %c0_i32_25 : i32
    %43 = arith.extui %42 : i1 to i32
    %c0_i32_26 = arith.constant 0 : i32
    %44 = arith.cmpi ne, %43, %c0_i32_26 : i32
    scf.if %44 {
      %c0_27 = arith.constant 0 : index
      %c0_28 = arith.constant 0 : index
      %c0_29 = arith.constant 0 : index
      %45 = vector.load %arg15[%c0_27, %c0_28, %c0_29] : memref<1x8x32xf32, #tpu.memory_space<vmem>>, vector<1x8x32xf32>
      %46 = vector.shape_cast %45 : vector<1x8x32xf32> to vector<8x32xf32>
      %c0_30 = arith.constant 0 : index
      %c0_31 = arith.constant 0 : index
      %c0_32 = arith.constant 0 : index
      %47 = vector.load %arg14[%c0_30, %c0_31, %c0_32] : memref<1x1x32xf32, #tpu.memory_space<vmem>>, vector<1x1x32xf32>
      %48 = vector.shape_cast %47 : vector<1x1x32xf32> to vector<1x32xf32>
      %49 = vector.broadcast %48 : vector<1x32xf32> to vector<8x32xf32>
      %50 = arith.addf %46, %49 : vector<8x32xf32>
      %c0_33 = arith.constant 0 : index
      %c0_34 = arith.constant 0 : index
      %c0_35 = arith.constant 0 : index
      %51 = vector.load %arg15[%c0_33, %c0_34, %c0_35] : memref<1x8x32xf32, #tpu.memory_space<vmem>>, vector<1x8x32xf32>
      %52 = vector.shape_cast %51 : vector<1x8x32xf32> to vector<8x32xf32>
      %53 = vector.shape_cast %50 : vector<8x32xf32> to vector<1x8x32xf32>
      tpu.vector_store %arg15[%c0_33, %c0_34, %c0_35], %53 {strides = array<i32>} : memref<1x8x32xf32, #tpu.memory_space<vmem>>, vector<1x8x32xf32>,
    } else {
    }
    return
  }
  func.func @transform_0(%arg0: i32, %arg1: i32, %arg2: i32) -> (i32, i32, i32) {
    %c0_i32 = arith.constant 0 : i32
    %c0_i32_0 = arith.constant 0 : i32
    %c0_i32_1 = arith.constant 0 : i32
    return %arg0, %c0_i32, %c0_i32_0 : i32, i32, i32
  }
  func.func @transform_1(%arg0: i32, %arg1: i32, %arg2: i32) -> (i32, i32, i32) {
    %c0_i32 = arith.constant 0 : i32
    %c0_i32_0 = arith.constant 0 : i32
    %c0_i32_1 = arith.constant 0 : i32
    return %arg1, %c0_i32, %c0_i32_0 : i32, i32, i32
  }
  func.func @transform_2(%arg0: i32, %arg1: i32, %arg2: i32) -> (i32, i32, i32) {
    %c0_i32 = arith.constant 0 : i32
    %c0_i32_0 = arith.constant 0 : i32
    %c0_i32_1 = arith.constant 0 : i32
    return %arg1, %c0_i32, %c0_i32_0 : i32, i32, i32
  }
  func.func @transform_3(%arg0: i32, %arg1: i32, %arg2: i32) -> (i32, i32, i32) {
    %c0_i32 = arith.constant 0 : i32
    %c0_i32_0 = arith.constant 0 : i32
    %c0_i32_1 = arith.constant 0 : i32
    return %arg1, %c0_i32, %c0_i32_0 : i32, i32, i32
  }
  func.func @transform_4(%arg0: i32, %arg1: i32, %arg2: i32) -> (i32, i32, i32) {
    %c0_i32 = arith.constant 0 : i32
    %c0_i32_0 = arith.constant 0 : i32
    %c0_i32_1 = arith.constant 0 : i32
    return %arg1, %c0_i32, %c0_i32_0 : i32, i32, i32
  }
  func.func @transform_5(%arg0: i32, %arg1: i32, %arg2: i32) -> (i32, i32, i32) {
    %c0_i32 = arith.constant 0 : i32
    %c0_i32_0 = arith.constant 0 : i32
    %c0_i32_1 = arith.constant 0 : i32
    return %arg1, %c0_i32, %c0_i32_0 : i32, i32, i32
  }
  func.func @transform_6(%arg0: i32, %arg1: i32, %arg2: i32) -> (i32, i32, i32) {
    %c0_i32 = arith.constant 0 : i32
    %c0_i32_0 = arith.constant 0 : i32
    %c0_i32_1 = arith.constant 0 : i32
    return %arg1, %c0_i32, %c0_i32_0 : i32, i32, i32
  }
  func.func @transform_7(%arg0: i32, %arg1: i32, %arg2: i32) -> (i32, i32, i32) {
    %c0_i32 = arith.constant 0 : i32
    %c0_i32_0 = arith.constant 0 : i32
    %c0_i32_1 = arith.constant 0 : i32
    return %arg1, %c0_i32, %c0_i32_0 : i32, i32, i32
  }
  func.func @transform_8(%arg0: i32, %arg1: i32, %arg2: i32) -> (i32, i32, i32) {
    %c0_i32 = arith.constant 0 : i32
    %c0_i32_0 = arith.constant 0 : i32
    return %arg1, %c0_i32, %arg2 : i32, i32, i32
  }
  func.func @transform_9(%arg0: i32, %arg1: i32, %arg2: i32) -> (i32, i32, i32) {
    %c0_i32 = arith.constant 0 : i32
    %c0_i32_0 = arith.constant 0 : i32
    return %arg1, %c0_i32, %arg2 : i32, i32, i32
  }
  func.func @transform_10(%arg0: i32, %arg1: i32, %arg2: i32) -> (i32, i32, i32) {
    %c0_i32 = arith.constant 0 : i32
    %c0_i32_0 = arith.constant 0 : i32
    return %arg1, %arg2, %c0_i32 : i32, i32, i32
  }
  func.func @transform_11(%arg0: i32, %arg1: i32, %arg2: i32) -> (i32, i32, i32) {
    %c0_i32 = arith.constant 0 : i32
    %c0_i32_0 = arith.constant 0 : i32
    %c0_i32_1 = arith.constant 0 : i32
    return %arg1, %c0_i32, %c0_i32_0 : i32, i32, i32
  }
  func.func @transform_12(%arg0: i32, %arg1: i32, %arg2: i32) -> (i32, i32, i32) {
    %c0_i32 = arith.constant 0 : i32
    %c0_i32_0 = arith.constant 0 : i32
    %c0_i32_1 = arith.constant 0 : i32
    return %arg0, %c0_i32, %c0_i32_0 : i32, i32, i32
  }
}

</mosaic_0001>

<bundles_post_ra>
// kernel: tpu_custom_call.1
= control target key start
LH: loop header
LB: loop body
LE: loop exit
PB: predicated region body
PF: predicated region fallthrough
CT: control target
= control target key end

     0   :  { %s3906_s0 = inlined_call_operand.hbm [shape: f32[2,8,32], index: 0, kind: input, shape index: {}]   ;;  %s3907_s1 = inlined_call_operand.vmem [shape: f32[2,1,32], index: 1, kind: input, shape index: {}]   ;;  %s3908_s2 = inlined_call_operand.vmem [shape: f32[2,1,32], index: 2, kind: input, shape index: {}]   ;;  %s3909_s3 = inlined_call_operand.vmem [shape: bf16[2,32,96], index: 3, kind: input, shape index: {}]   ;;  %s3910_s4 = inlined_call_operand.vmem [shape: bf16[2,32,32], index: 4, kind: input, shape index: {}]   ;;  %s3911_s5 = inlined_call_operand.hbm [shape: f32[2,1,32], index: 5, kind: input, shape index: {}]   ;;  %s3912_s6 = inlined_call_operand.hbm [shape: f32[2,1,32], index: 6, kind: input, shape index: {}]   ;;  %s3913_s7 = inlined_call_operand.hbm [shape: f32[2,1,32], index: 7, kind: input, shape index: {}]   ;;  %s3914_s8 = inlined_call_operand.vmem [shape: bf16[2,32,64], index: 8, kind: input, shape index: {}]   ;;  %s3915_s9 = inlined_call_operand.hbm [shape: f32[2,1,64], index: 9, kind: input, shape index: {}]   ;;  %s3916_s10 = inlined_call_operand.vmem [shape: bf16[2,64,32], index: 10, kind: input, shape index: {}]   ;;  %s3917_s11 = inlined_call_operand.vmem [shape: f32[2,1,32], index: 11, kind: input, shape index: {}]   ;;  %s3918_s12 = inlined_call_operand.hbm [shape: f32[2,8,32], index: 12, kind: output, shape index: {}]  }
   0x1   :  { %3939 = sst [smem:[#allocation29_spill]] %s3906_s0 }
   0x2   :  { %3940 = sst [smem:[#allocation30_spill]] %s3907_s1 }
   0x3   :  { %3941 = sst [smem:[#allocation31_spill]] %s3908_s2 }
   0x4   :  { %3942 = sst [smem:[#allocation32_spill]] %s3909_s3 }
   0x5   :  { %3943 = sst [smem:[#allocation33_spill]] %s3910_s4 }
   0x6   :  { %3944 = sst [smem:[#allocation34_spill]] %s3911_s5 }
   0x7   :  { %3945 = sst [smem:[#allocation35_spill]] %s3912_s6 }
   0x8   :  { %3946 = sst [smem:[#allocation36_spill]] %s3913_s7 }
   0x9   :  { %3947 = sst [smem:[#allocation37_spill]] %s3914_s8 }
   0xa   :  { %3948 = sst [smem:[#allocation38_spill]] %s3915_s9 }
   0xb   :  { %3949 = sst [smem:[#allocation39_spill]] %s3916_s10 }
   0xc   :  { %3950 = sst [smem:[#allocation40_spill]] %s3917_s11 }
   0xd   :  { %3951 = sst [smem:[#allocation41_spill]] %s3918_s12 }
   0xe   :  { %17 = vsyncpa [#allocation4], 0 }
   0xf   :  { %19 = vsyncpa [#allocation4 + $0x1], 0 }
  0x10   :  { %20 = vsyncpa [#allocation7], 0 }
  0x11   :  { %22 = vsyncpa [#allocation7 + $0x1], 0 }
  0x12   :  { %23 = vsyncpa [#allocation10], 0 }
  0x13   :  { %25 = vsyncpa [#allocation10 + $0x1], 0 }
  0x14   :  { %26 = vsyncpa [#allocation5], 0 }
  0x15   :  { %28 = vsyncpa [#allocation5 + $0x1], 0  ;;  %s3217_s21 = smov 0   ;;  %s3219_s22 = smov 0  }
  0x16   :  { %s3221_s23 = smov 0   ;;  %s3223_s24 = smov 0  }
  0x17   :  { %s3225_s25 = smov 0   ;;  %s3227_s26 = smov 0  }
  0x18   :  { %s3229_s27 = smov 0   ;;  %s3231_s28 = smov 0  }
  0x19   :  { %s3233_s29 = smov 0   ;;  %s3235_s30 = smov 0  }
  0x1a   :  { %s3237_s13 = smov 0  }
  0x1b LB: > { %3952 = sst [smem:[#allocation17_spill]] %s3099_s23  ;;  %s49_s14 = sadd.s32 1, %s3123_s29  ;;  %s3131_s13 = sphi %s3237_s13, %s34_s13   ;;  %s3127_s30 = sphi %s3235_s30, %s4022_s30   ;;  %s3123_s29 = sphi %s3233_s29, %s4021_s29   ;;  %s3119_s28 = sphi %s3231_s28, %s4020_s28   ;;  %s3115_s27 = sphi %s3229_s27, %s4019_s27   ;;  %s3111_s26 = sphi %s3227_s26, %s4018_s26   ;;  %s3107_s25 = sphi %s3225_s25, %s4026_s25   ;;  %s3103_s24 = sphi %s3223_s24, %s4025_s24   ;;  %s3099_s23 = sphi %s3221_s23, %s4016_s23   ;;  %s3095_s22 = sphi %s3219_s22, %s4024_s22   ;;  %s3091_s21 = sphi %s3217_s21, %s4023_s21  }
  0x1c   : > { %3953 = sst [smem:[#allocation18_spill]] %s3111_s26  ;;  %p3924_p0 = scmp.eq.s32.totalorder %s3131_s13, 0 }
  0x1d   : > { %3954 = sst [smem:[#allocation19_spill]] %s3115_s27  ;;  %p3274_p1 = scmp.ge.s32.totalorder %s49_s14, 2 }
  0x1e   : > { %3955 = sst [smem:[#allocation20_spill]] %s3119_s28  ;;  %s190_s16 = sadd.s32 1, %s3099_s23 }
  0x1f   : > { %3956 = sst [smem:[#allocation21_spill]] %s3123_s29  ;;  %p197_p2 = scmp.ne.s32.totalorder %s3099_s23, %s3095_s22 }
  0x20   : > { %3957 = sst [smem:[#allocation22_spill]] %s3127_s30  ;;  %s4028_s14 = smov (%p3274_p1, %s49_s14), 0 }
  0x21   : > { %s3958_s15 = scalar_select %p3274_p1, 1, 0 }
  0x22   : > { %3959 = sst [smem:[#allocation23_spill]] %s4028_s14  ;;  %p199_p4 = por %p197_p2, %p3924_p0 }
  0x23   : > { %s187_s17 = ssub.s32 %s3123_s29, %s4028_s14  ;;  %p3923_p5 = scmp.lt.s32.totalorder %s3131_s13, 4 }
  0x24   : > { %p188_p6 = scmp.eq.s32.totalorder %s187_s17, 0  ;;  %s3925_s18 = sand.u32 1, %s3131_s13  }
  0x25   : > { %s3294_s19 = sand.u32 1, %s3099_s23   ;;  %s3300_s12 = sshll.u32 %s3123_s29, 4 }
  0x26   : > { %s3297_s20 = scalar_select %p188_p6, %s3099_s23, %s190_s16  }
  0x27   : > { %s3961_s5 = sld [smem:[#allocation34_spill]]  ;;  %s464_s14 = scalar_lea.vmem [#allocation6], %s3294_s19 }
  0x28   : > { %3960 = sst [smem:[#allocation24_spill]] %s3297_s20  ;;  %s471_s17 = sshll.u32 %s464_s14, 4  ;;  %s3309_s17 = int_to_ptr.vmem [resolvable:$true] %s471_s17 }
  0x29   : > { %p3313_p7 = pnand %p3923_p5, %p199_p4  ;;  %s3321_s11 = scalar_lea.sflag [#allocation7], %s3925_s18 }
  0x2b   : > { %s3962_s16 = scalar_select %p3313_p7, 1, 0 }
  0x2c   : > { %p3327_p11 = pneg %p3313_p7 }
  0x2d   : > { %s3306_s10 = scalar_lea.hbm %s3961_s5, %s3300_s12  ;;  %s2856_s23 = scalar_lea.hbm %s3961_s5, 32 }
  0x2e   : > { %s2851_s28 = scalar_lea.hbm %s3306_s10, 16  ;;  %p2857_p2 = scmp.lt.u32.totalorder %s3306_s10, %s3961_s5 }
  0x2f   : > { %p2852_p10 = scmp.ne.s32.totalorder %s3306_s10, %s2851_s28  ;;  %p2858_p4 = scmp.lt.u32.totalorder %s2856_s23, %s2851_s28 }
  0x30   : > { %p2860_p5 = scmp.lt.u32.totalorder %s2851_s28, %s3306_s10 }
  0x31   : > { %p2854_p12 = pnand %p3327_p11, %p2852_p10  ;;  %p2859_p6 = por %p2858_p4, %p2857_p2 }
  0x33   : > { %p2855_p13 = pneg %p2854_p12  ;;  %p2861_p3 = por %p2860_p5, %p2859_p6 }
  0x35   : > { %p2862_p0 = pnand %p2861_p3, %p2855_p13 }
  0x37   : > { %2865 = shalt.err (!%p2862_p0)
}
  0x38   : > { %s2866_s18 = scalar_lea.vmem %s3309_s17, 16  ;;  %s3133_s20 = smov [#allocation6]  }
  0x39   : > { %p2867_p10 = scmp.ne.s32.totalorder %s3309_s17, %s2866_s18  ;;  %s2871_s14 = sshll.u32 %s3133_s20, 4  ;;  %s2872_s14 = int_to_ptr.vmem [resolvable:$false] %s2871_s14 }
  0x3a   : > { %s2873_s4 = scalar_lea.vmem %s2872_s14, 32  ;;  %p2874_p9 = scmp.lt.s32.totalorder %s3309_s17, %s2872_s14 }
  0x3b   : > { %p2869_p12 = pnand %p2867_p10, %p3327_p11  ;;  %p2875_p1 = scmp.lt.s32.totalorder %s2873_s4, %s2866_s18 }
  0x3d   : > { %p2870_p8 = pneg %p2869_p12  ;;  %p2876_p2 = por %p2875_p1, %p2874_p9 }
  0x3f   : > { %p2877_p4 = pnand %p2876_p2, %p2870_p8 }
  0x41   : > { %2880 = shalt.err (!%p2877_p4)
}
  0x42   : > { %2694 = dma.hbm_to_vmem [thread:$0]  (!%p3313_p7), %s3306_s10, 16, %s3309_s17, %s3321_s11  }
  0x43   : > { %p3964_p0 = scmp.lt.s32.totalorder %s3131_s13, 5  ;;  %p3965_p3 = scmp.ge.s32.totalorder %s3131_s13, 1 }
  0x44   : > { %s3967_s7 = sld [smem:[#allocation36_spill]]  ;;  %s498_s20 = scalar_lea.vmem [#allocation9], %s3294_s19 }
  0x45   : > { %p3355_p5 = pnand %p3965_p3, %p3964_p0  ;;  %s505_s14 = sshll.u32 %s498_s20, 4  ;;  %s506_s14 = int_to_ptr.vmem [resolvable:$true] %s505_s14 }
  0x46   : > { %s3968_s4 = sand.u32 1, %s3131_s13  }
  0x47   : > { %s3966_s8 = scalar_select %p3355_p5, 1, 0 }
  0x48   : > { %s3368_s10 = scalar_lea.sflag [#allocation10], %s3968_s4 }
  0x4a   : > { %s3363_s28 = scalar_lea.hbm %s3967_s7, %s3300_s12  ;;  %s2886_s23 = scalar_lea.hbm %s3967_s7, 32 }
  0x4b   : > { %s2881_s17 = scalar_lea.hbm %s3363_s28, 16  ;;  %p2887_p13 = scmp.lt.u32.totalorder %s3363_s28, %s3967_s7 }
  0x4c   : > { %p2882_p1 = scmp.ne.s32.totalorder %s3363_s28, %s2881_s17  ;;  %p2888_p6 = scmp.lt.u32.totalorder %s2886_s23, %s2881_s17 }
  0x4d   : > { %p2890_p12 = scmp.lt.u32.totalorder %s2881_s17, %s3363_s28 }
  0x4e   : > { %p2884_p8 = pnand %p2882_p1, %p3327_p11  ;;  %p2889_p10 = por %p2888_p6, %p2887_p13 }
  0x50   : > { %p2885_p9 = pneg %p2884_p8  ;;  %p2891_p2 = por %p2890_p12, %p2889_p10 }
  0x52   : > { %p2892_p4 = pnand %p2891_p2, %p2885_p9 }
  0x54   : > { %2895 = shalt.err (!%p2892_p4)
}
  0x55   : > { %s2896_s20 = scalar_lea.vmem %s506_s14, 16  ;;  %s3134_s4 = smov [#allocation9]  }
  0x56   : > { %p2897_p0 = scmp.ne.s32.totalorder %s506_s14, %s2896_s20  ;;  %s2901_s1 = sshll.u32 %s3134_s4, 4  ;;  %s2902_s1 = int_to_ptr.vmem [resolvable:$false] %s2901_s1 }
  0x57   : > { %s2903_s3 = scalar_lea.vmem %s2902_s1, 32  ;;  %p2904_p8 = scmp.lt.s32.totalorder %s506_s14, %s2902_s1 }
  0x58   : > { %p2899_p3 = pnand %p2897_p0, %p3327_p11  ;;  %p2905_p5 = scmp.lt.s32.totalorder %s2903_s3, %s2896_s20 }
  0x5a   : > { %p2900_p1 = pneg %p2899_p3  ;;  %p2906_p7 = por %p2905_p5, %p2904_p8 }
  0x5c   : > { %p2907_p6 = pnand %p2906_p7, %p2900_p1 }
  0x5e   : > { %2910 = shalt.err (!%p2907_p6)
}
  0x5f   : > { %p3969_p13 = scmp.ne.s32.totalorder %s3962_s16, 0  ;;  %s3389_s1 = sadd.s32 4294967295, %s3131_s13  }
  0x60   : > { %s2503_s2 = sadd.s32 4294967294, %s3131_s13   ;;  %s53_s5 = sadd.s32 1, %s3127_s30 }
  0x61   : > { %2700 = dma.hbm_to_vmem [thread:$0]  (!%p3969_p13), %s3363_s28, 16, %s506_s14, %s3368_s10  }
  0x62   : > { %p3970_p7 = scmp.ne.s32.totalorder %s3958_s15, 0  ;;  %s60_s17 = sadd.s32 1, %s3111_s26 }
  0x63   : > { %p67_p5 = scmp.ne.s32.totalorder %s3111_s26, %s3107_s25  ;;  %p73_p10 = scmp.ne.s32.totalorder %s3107_s25, %s3103_s24 }
  0x64   : > { %s4030_s5 = smov (!%p3970_p7, %s53_s5), %s3127_s30  ;;  %p3971_p12 = scmp.eq.s32.totalorder %s3131_s13, 0 }
  0x65   : > { %p55_p9 = scmp.ge.s32.totalorder %s4030_s5, 2  ;;  %p74_p4 = scmp.eq.s32.totalorder %s3389_s1, 0 }
  0x66   : > { %p3403_p2 = por %p3971_p12, %p67_p5  ;;  %p3975_p3 = scmp.ne.s32.totalorder %s3095_s22, %s3091_s21 }
  0x67   : > { %s4032_s5 = smov (%p55_p9, %s4030_s5), 0  ;;  %p3413_p0 = por %p74_p4, %p73_p10 }
  0x68   : > { %3973 = sst [smem:[#allocation25_spill]] %s4032_s5  ;;  %p3420_p1 = por %p3975_p3, %p74_p4 }
  0x69   : > { %s3974_s15 = scalar_select %p3413_p0, 1, 0 }
  0x6a   : > { %s3976_s14 = scalar_select %p3420_p1, 1, 0 }
  0x6b   : > { %s57_s23 = ssub.s32 %s3127_s30, %s4032_s5  ;;  %p389_p8 = scmp.eq.s32.totalorder %s3389_s1, 3 }
  0x6c   : > { %3977 = sst [smem:[#allocation26_spill]] %s3976_s14  ;;  %p58_p6 = scmp.eq.s32.totalorder %s57_s23, 0 }
  0x6d   : > { %p395_p7 = scmp.eq.s32.totalorder %s2503_s2, 3  ;;  %p3427_p9 = por %p389_p8, %p67_p5 }
  0x6e   : > { %s415_s20 = sand.u32 1, %s3111_s26   ;;  %s2507_s7 = sshll.u32 %s3127_s30, 7 }
  0x6f   : > { %s3978_s18 = scalar_select %p3427_p9, 1, 0 }
  0x70   : > { %s3433_s4 = scalar_select %p58_p6, %s3111_s26, %s60_s17  }
  0x71   : > { %p3438_p12 = por %p395_p7, %p73_p10  ;;  %s2506_s21 = sshll.u32 %s415_s20, 3 }
  0x72   : > { %3979 = sst [smem:[#allocation27_spill]] %s3433_s4  ;;  %s3982_s0 = sld [smem:[#allocation29_spill]] }
  0x73   : > { %s3980_s3 = scalar_select %p3438_p12, 1, 0 }
  0x74   : > { %s419_s2 = scalar_lea.vmem [#allocation3], %s2506_s21  ;;  %p3983_p5 = scmp.lt.s32.totalorder %s3131_s13, 4 }
  0x75   : > { %3981 = sst [smem:[#allocation28_spill]] %s3980_s3  ;;  %s426_s23 = sshll.u32 %s419_s2, 4  ;;  %s3456_s23 = int_to_ptr.vmem [resolvable:$true] %s426_s23 }
  0x76   : > { %p3452_p4 = pnand %p3983_p5, %p3403_p2  ;;  %s3985_s6 = sld [smem:[#allocation35_spill]] }
  0x77   : > { %s416_s14 = scalar_lea.sflag [#allocation4], %s415_s20 }
  0x78   : > { %s3446_s5 = scalar_lea.hbm %s3982_s0, %s2507_s7  ;;  %p2913_p3 = pneg %p3452_p4 }
  0x79   : > { %s2911_s4 = scalar_lea.hbm %s3446_s5, 128  ;;  %s2916_s2 = scalar_lea.hbm %s3982_s0, 256 }
  0x7a   : > { %p2912_p10 = scmp.ne.s32.totalorder %s3446_s5, %s2911_s4  ;;  %p2917_p6 = scmp.lt.u32.totalorder %s3446_s5, %s3982_s0 }
  0x7b   : > { %p2918_p7 = scmp.lt.u32.totalorder %s2916_s2, %s2911_s4  ;;  %p2920_p12 = scmp.lt.u32.totalorder %s2911_s4, %s3446_s5 }
  0x7c   : > { %s3462_s7 = scalar_lea.hbm %s3985_s6, %s3300_s12  ;;  %p2914_p2 = pnand %p2913_p3, %p2912_p10 }
  0x7d   : > { %p2919_p5 = por %p2918_p7, %p2917_p6 }
  0x7e   : > { %p2915_p8 = pneg %p2914_p2 }
  0x7f   : > { %p2921_p9 = por %p2920_p12, %p2919_p5 }
  0x81   : > { %p2922_p1 = pnand %p2921_p9, %p2915_p8 }
  0x83   : > { %2925 = shalt.err (!%p2922_p1)
}
  0x84   : > { %s2926_s30 = scalar_lea.vmem %s3456_s23, 128  ;;  %s3135_s20 = smov [#allocation3]  }
  0x85   : > { %p2927_p10 = scmp.ne.s32.totalorder %s3456_s23, %s2926_s30  ;;  %s2931_s27 = sshll.u32 %s3135_s20, 4  ;;  %s2932_s27 = int_to_ptr.vmem [resolvable:$false] %s2931_s27 }
  0x86   : > { %s2933_s26 = scalar_lea.vmem %s2932_s27, 256  ;;  %p2934_p13 = scmp.lt.s32.totalorder %s3456_s23, %s2932_s27 }
  0x87   : > { %p2929_p2 = pnand %p2927_p10, %p2913_p3  ;;  %p2935_p6 = scmp.lt.s32.totalorder %s2933_s26, %s2926_s30 }
  0x89   : > { %p2930_p0 = pneg %p2929_p2  ;;  %p2936_p7 = por %p2935_p6, %p2934_p13 }
  0x8b   : > { %p2937_p12 = pnand %p2936_p7, %p2930_p0 }
  0x8d   : > { %2940 = shalt.err (!%p2937_p12)
}
  0x8e   : > { %2691 = dma.hbm_to_vmem [thread:$0]  (!%p3452_p4), %s3446_s5, 128, %s3456_s23, %s416_s14  }
  0x8f   : > { %s481_s4 = scalar_lea.vmem [#allocation8], %s3294_s19  ;;  %s3986_s9 = sld [smem:[#allocation38_spill]] }
  0x90   : > { %s488_s3 = sshll.u32 %s481_s4, 4  ;;  %s2941_s30 = scalar_lea.hbm %s3462_s7, 16  ;;  %s489_s3 = int_to_ptr.vmem [resolvable:$true] %s488_s3 }
  0x91   : > { %p2942_p13 = scmp.ne.s32.totalorder %s3462_s7, %s2941_s30  ;;  %s2946_s27 = scalar_lea.hbm %s3985_s6, 32 }
  0x92   : > { %p2947_p9 = scmp.lt.u32.totalorder %s3462_s7, %s3985_s6  ;;  %p2948_p4 = scmp.lt.u32.totalorder %s2946_s27, %s2941_s30 }
  0x93   : > { %p2944_p0 = pnand %p2942_p13, %p3327_p11  ;;  %p2950_p8 = scmp.lt.u32.totalorder %s2941_s30, %s3462_s7 }
  0x94   : > { %p2949_p3 = por %p2948_p4, %p2947_p9 }
  0x95   : > { %s3494_s2 = scalar_lea.hbm %s3986_s9, %s3300_s12  ;;  %p2945_p1 = pneg %p2944_p0 }
  0x96   : > { %p2951_p5 = por %p2950_p8, %p2949_p3 }
  0x98   : > { %p2952_p10 = pnand %p2951_p5, %p2945_p1 }
  0x9a   : > { %2955 = shalt.err (!%p2952_p10)
}
  0x9b   : > { %s2956_s12 = scalar_lea.vmem %s489_s3, 16  ;;  %s3136_s5 = smov [#allocation8]  }
  0x9c   : > { %p2957_p2 = scmp.ne.s32.totalorder %s489_s3, %s2956_s12  ;;  %s2961_s23 = sshll.u32 %s3136_s5, 4  ;;  %s2962_s23 = int_to_ptr.vmem [resolvable:$false] %s2961_s23 }
  0x9d   : > { %s2963_s14 = scalar_lea.vmem %s2962_s23, 32  ;;  %p2964_p12 = scmp.lt.s32.totalorder %s489_s3, %s2962_s23 }
  0x9e   : > { %p2959_p6 = pnand %p2957_p2, %p3327_p11  ;;  %p2965_p13 = scmp.lt.s32.totalorder %s2963_s14, %s2956_s12 }
  0xa0   : > { %p2960_p7 = pneg %p2959_p6  ;;  %p2966_p0 = por %p2965_p13, %p2964_p12 }
  0xa2   : > { %p2967_p4 = pnand %p2966_p0, %p2960_p7 }
  0xa4   : > { %2970 = shalt.err (!%p2967_p4)
}
  0xa5   : > { %p3987_p9 = scmp.ne.s32.totalorder %s3962_s16, 0  ;;  %s526_s0 = scalar_lea.vmem [#allocation11], %s3294_s19 }
  0xa6   : > { %s534_s4 = sshll.u32 %s526_s0, 4  ;;  %s2971_s28 = scalar_lea.hbm %s3494_s2, 16  ;;  %s535_s4 = int_to_ptr.vmem [resolvable:$true] %s534_s4 }
  0xa7   : > { %2697 = dma.hbm_to_vmem [thread:$0]  (!%p3987_p9), %s3462_s7, 16, %s489_s3, %s3321_s11  }
  0xa8   : > { %p2972_p1 = scmp.ne.s32.totalorder %s3494_s2, %s2971_s28  ;;  %s2976_s17 = scalar_lea.hbm %s3986_s9, 32 }
  0xa9   : > { %p2977_p5 = scmp.lt.u32.totalorder %s3494_s2, %s3986_s9  ;;  %p2978_p10 = scmp.lt.u32.totalorder %s2976_s17, %s2971_s28 }
  0xaa   : > { %p2974_p3 = pnand %p2972_p1, %p3327_p11  ;;  %p2980_p6 = scmp.lt.u32.totalorder %s2971_s28, %s3494_s2 }
  0xab   : > { %p2979_p2 = por %p2978_p10, %p2977_p5 }
  0xac   : > { %p2975_p8 = pneg %p2974_p3 }
  0xad   : > { %p2981_p7 = por %p2980_p6, %p2979_p2 }
  0xaf   : > { %p2982_p12 = pnand %p2981_p7, %p2975_p8 }
  0xb1   : > { %2985 = shalt.err (!%p2982_p12)
}
  0xb2   : > { %s2986_s19 = scalar_lea.vmem %s535_s4, 16  ;;  %s3137_s11 = smov [#allocation11]  }
  0xb3   : > { %p2987_p13 = scmp.ne.s32.totalorder %s535_s4, %s2986_s19  ;;  %s2991_s7 = sshll.u32 %s3137_s11, 4  ;;  %s2992_s7 = int_to_ptr.vmem [resolvable:$false] %s2991_s7 }
  0xb4   : > { %s2993_s3 = scalar_lea.vmem %s2992_s7, 32  ;;  %p2994_p1 = scmp.lt.s32.totalorder %s535_s4, %s2992_s7 }
  0xb5   : > { %p2989_p0 = pnand %p2987_p13, %p3327_p11  ;;  %p2995_p3 = scmp.lt.s32.totalorder %s2993_s3, %s2986_s19 }
  0xb7   : > { %p2990_p4 = pneg %p2989_p0  ;;  %p2996_p9 = por %p2995_p3, %p2994_p1 }
  0xb9   : > { %p2997_p5 = pnand %p2996_p9, %p2990_p4 }
  0xbb   : > { %3000 = shalt.err (!%p2997_p5)
}
  0xbc   : > { %p3988_p10 = scmp.ne.s32.totalorder %s3962_s16, 0  ;;  %p3989_p8 = scmp.ne.s32.totalorder %s3966_s8, 0 }
  0xbd   : > { %s3536_s29 = sand.u32 (!%p3989_p8), 1, %s3107_s25   ;;  %p3990_p11 = scmp.ne.s32.totalorder (!%p3989_p8), %s3974_s15, 0 }
  0xbe   : > { %2703 = dma.hbm_to_vmem [thread:$0]  (!%p3988_p10), %s3494_s2, 16, %s535_s4, %s3368_s10  }
  0xbf   : > { %562 = sbr.rel (%p3989_p8) target bundleno = 2844 (0xb1c), region = 68  ;;  %s2513_s26 = sshll.u32 (!%p3989_p8), %s3536_s29, 3 }
  0xc0   : > { %s565_s12 = scalar_lea.sflag (!%p3989_p8), [#allocation4], %s3536_s29  ;;  %s568_s5 = scalar_lea.vmem (!%p3989_p8), [#allocation3], %s2513_s26 }
  0xc6   : > { %3074 = dma.done.wait (%p3990_p11), %s565_s12, 128  }
  0xc7   : > { %3076 = vsyncadd (%p3990_p11), %s565_s12, 4294967168  ;;  %s3991_s16 = sld [smem:[#allocation26_spill]]  ;;  %s573_s10 = sand.u32 1, %s3389_s1  }
  0xc8   : > { %s3546_s8 = sand.u32 1, %s3095_s22   ;;  %s574_s2 = scalar_lea.sflag [#allocation7], %s573_s10 }
  0xcd   : > { %p3992_p9 = scmp.ne.s32.totalorder %s3991_s16, 0 }
  0xcf   : > { %3078 = dma.done.wait (%p3992_p9), %s574_s2, 32  }
  0xd0   : > { %3080 = vsyncadd (%p3992_p9), %s574_s2, 4294967264  ;;  %s590_s15 = scalar_lea.sflag [#allocation10], %s573_s10 }
  0xd1   : > { %3082 = dma.done.wait (%p3992_p9), %s590_s15, 32  }
  0xd2   : > { %3084 = vsyncadd (%p3992_p9), %s590_s15, 4294967264  ;;  %s3993_s1 = sld [smem:[#allocation19_spill]]  ;;  %s3996_s16 = sld [smem:[#allocation32_spill]] }
  0xd3   : > { %s3997_s0 = sld [smem:[#allocation33_spill]]  ;;  %s3998_s23 = sld [smem:[#allocation37_spill]] }
  0xd4   : > { %s3999_s17 = sld [smem:[#allocation39_spill]]  ;;  %s4000_s9 = sld [smem:[#allocation40_spill]] }
  0xd5   : > { %s600_s12 = scalar_lea.vmem [#allocation11], %s3546_s8 }
  0xd8   : > { %p693_p2 = scmp.lt.s32.totalorder %s3993_s1, 1  ;;  %p731_p6 = scmp.eq.s32.totalorder %s3993_s1, 0 }
  0xd9   : > { %v737_v0 = vld [vmem:[%s568_s5] sm:$0xff] (%p731_p6)  ;;  %vm738_vm0 = vcmask (%p731_p6), 261120  }
  0xda   : > { %s4034_s1 = smov (!%p693_p2, %s3993_s1), 1  ;;  %736 = sbr.rel (!%p731_p6) target bundleno = 225 (0xe1), region = 92 }
  0xdb   : > { %s2557_s11 = sshll.u32 %s4034_s1, 4  ;;  %s2560_s7 = sshll.u32 %s4034_s1, 5 }
  0xdc   : > { %s703_s10 = scalar_lea.vmem %s3996_s16, %s2557_s11  ;;  %s3580_s14 = scalar_lea.vmem %s3997_s0, %s2557_s11 }
  0xdd   : > { %s3585_s6 = scalar_lea.vmem %s3998_s23, %s2557_s11  ;;  %s3590_s20 = scalar_lea.vmem %s3999_s17, %s2560_s7 }
  0xde   : > { %s729_s3 = scalar_lea.vmem %s4000_s9, %s4034_s1  ;;  %s3597_s16 = scalar_lea.vmem [#allocation12], %s2513_s26 }
  0xdf   : > { %739 = vst.msk [vmem:[%s3597_s16] sm:$0xff] (%p731_p6), %vm738_vm0, %v737_v0 }
  0xe1 PF: > { %vm746_vm1 = vcmask 261120   ;;  %v2811_v8 = vld [vmem:[%s703_s10] sm:$0xff]   ;;  %v3138_v9 = vmov 0.0   ;;  %vm3139_vm2 = vmmov 0   ;;  %v2812_v10 = vld [vmem:[%s703_s10 + $0x8] sm:$0xff]   ;;  %s4001_s5 = sld [smem:[#allocation30_spill]]  ;;  %v848_v33 = vlaneseq }
  0xe2   : > { %2592 = vmatprep.subr.bf16.mxu0 %v3138_v9  ;;  %2596 = vmatprep.mubr.msk.bf16.mxu0 %vm3139_vm2, %v3138_v9  ;;  %s4003_s19 = sld [smem:[#allocation31_spill]]  ;;  %s3140_s7 = smov 104   ;;  %v3145_v31 = vmov 1983009808   ;;  %v3146_v35 = vmov 1934713408  }
  0xe3   : > { %2593 = vmatpush3.bf16.msra.mxu0 %v2811_v8  ;;  %2600 = vmatprep.subr.bf16.mxu1 %v3138_v9  ;;  %s3141_s10 = smov 120   ;;  %s3142_s2 = smov 112   ;;  %v846_v32 = vunpack.c.l.s4 %v3145_v31  ;;  %v863_v36 = vunpack.c.l.s4 %v3146_v35  ;;  %v849_v38 = vshrl.u32 %v848_v33, 7  ;;  %v3147_v54 = vmov 0  }
  0xe4   : > { %2594 = vmatprep.subr.bf16.mxu0 %v3138_v9  ;;  %2602 = vmatprep.mubr.msk.bf16.mxu1 %vm3139_vm2, %v3138_v9  ;;  %s3143_s15 = smov 96   ;;  %s3144_s4 = smov 64   ;;  %vm1353_vm3 = vcmask 64512   ;;  %vm1601_vm4 = vcmask 1043456   ;;  %vm1966_vm5 = vcmask 130048   ;;  %vm1969_vm6 = vcmask 195584  }
  0xe5   : > { %v847_v37 = vunpack.c.0.s8 %v846_v32  ;;  %v864_v40 = vunpack.c.0.s8 %v863_v36  ;;  %s3149_s28 = smov 16   ;;  %s3150_s21 = smov 24   ;;  %vm2182_vm7 = vcmask 523264  }
  0xe6   : > { %v3601_v1 = vld [vmem:[%s3597_s16] sm:$0xff]  ;;  %s4005_s17 = scalar_lea.vmem [#allocation6], %s3546_s8  ;;  %s4006_s27 = scalar_lea.vmem [#allocation8], %s3546_s8 }
  0xe7   : > { %v747_v2 = vsel %vm746_vm1, %v3601_v1, 0.0  ;;  %2595 = vmatpush3.bf16.msra.mxu0 %v2812_v10  ;;  %s4002_s23 = scalar_lea.vmem %s4001_s5, %s4034_s1  ;;  %v3641_v41 = vsub.s32 %v847_v37, %v849_v38  ;;  %v3644_v44 = vsub.s32 %v864_v40, %v849_v38  ;;  %s4007_s9 = scalar_lea.vmem [#allocation9], %s3546_s8 }
  0xe8   : > { %748 = vadd.xlane.f32.xlu0 %v747_v2  ;;  %2606 = vmatprep.subr.bf16.mxu0 %v3138_v9  ;;  %v2524_v15 = vld [vmem:[%s4002_s23] ss:$0 sm:$0xff]  ;;  %s4004_s11 = scalar_lea.vmem %s4003_s19, %s4034_s1  ;;  %s2256_s5 = sshll.u32 %s3597_s16, 4  ;;  %s3843_s5 = int_to_ptr.vmem [resolvable:$true] %s2256_s5 }
  0xe9   : > { %v2525_v17 = vld [vmem:[%s4004_s11] ss:$0 sm:$0xff]  ;;  %s4010_s30 = sld [smem:[#allocation41_spill]]  ;;  %p4012_p12 = scmp.ne.s32.totalorder %s3978_s18, 0 }
  0xea   : > { %s3151_s1 = smov [#allocation12]  }
  0xef   : > { %s4011_s19 = smov %s4010_s30 }
 0x175   : > { %v749_v3 = vpop.xlane.xlu0 %748 }
 0x176   : > { %v751_v4 = vmul.f32 0.03125, %v749_v3 }
 0x178   : > { %v752_v5 = vsub.f32 %v3601_v1, %v751_v4 }
 0x17a   : > { %v753_v6 = vmul.f32 %v752_v5, %v752_v5 }
 0x17c   : > { %v754_v7 = vsel %vm746_vm1, %v753_v6, 0.0 }
 0x17d   : > { %755 = vadd.xlane.f32.xlu0 %v754_v7 }
 0x20a   : > { %v756_v11 = vpop.xlane.xlu0 %755 }
 0x20b   : > { %v757_v12 = vmul.f32 0.03125, %v756_v11 }
 0x20d   : > { %v758_v13 = vadd.f32 1e-05, %v757_v12 }
 0x20f   : > { %2821 = vrsqrt.f32 %v758_v13 }
 0x219   : > { %v2822_v14 = vpop.eup %2821 }
 0x21a   : > { %v760_v16 = vmul.f32 %v2822_v14, %v752_v5 }
 0x21c   : > { %v767_v18 = vmul.f32 %v2524_v15, %v760_v16 }
 0x21e   : > { %v774_v19 = vadd.f32 %v2525_v17, %v767_v18 }
 0x220   : > { %v775_v20 = vpack.c.bf16 %v774_v19, %v774_v19 }
 0x222   : > { %2597 = vmatmul.mubr.msk.bf16.vlgmr.msra.gmra.mrb[0].mxu0 %vm746_vm1, %v775_v20 }
 0x223   : > { %2608 = vmatprep.mubr.msk.bf16.mxu0 %vm3139_vm2, %v3138_v9 }
 0x2f5   : > { %v829_v21 = vpop.f32.mrb[0].mxu0 }
 0x2f6   : > { %v835_v22 = vmul.f32 0.35355338, %v829_v21  ;;  %v837_v23 = vpack.c.bf16 %v829_v21, %v829_v21  ;;  %v2598_v24 = vpop.f32.mrb[1].mxu0 }
 0x2f7   : > { %v832_v25 = vpop.f32.mrb[2].mxu0 }
 0x2f8   : > { %1011 = vrot.lane.b32.xlu0 %v837_v23, %s3140_s7  ;;  %1007 = vrot.lane.b32.xlu1 %v837_v23, %s3141_s10  ;;  %v2599_v26 = vpop.f32.mrb[3].mxu0  ;;  %v3628_v27 = vpack.c.bf16 %v835_v22, %v835_v22 }
 0x2fa   : > { %v851_v26 = vrot.slane %v3628_v27, %v3641_v41 }
 0x2fc   : > { %1009 = vrot.lane.b32.xlu1 %v837_v23, %s3142_s2  ;;  %843 = vrot.lane.b32.xlu0 %v3628_v27, %s3140_s7  ;;  %s2243_s7 = scalar_lea.sflag [#allocation5], %s3536_s29 }
 0x300   : > { %1013 = vrot.lane.b32.xlu1 %v837_v23, %s3143_s15  ;;  %1183 = vrot.lane.b32.xlu0 %v837_v23, %s3144_s4 }
 0x36a   : > { %v1008_v28 = vpop.permute.xlu1 %1007  ;;  %v3635_v30 = vpop.permute.xlu0 %1011 }
 0x36b   : > { %1015 = vrot.lane.b32.xlu1 %v1008_v28, %s3143_s15 }
 0x36e   : > { %v3632_v29 = vpop.permute.xlu1 %1009  ;;  %v844_v51 = vpop.permute.xlu0 %843 }
 0x36f   : > { %1017 = vrot.lane.b32.xlu1 %v3632_v29, %s3143_s15  ;;  %v893_v59 = vrot.slane %v844_v51, %v3641_v41 }
 0x372   : > { %v1014_v34 = vpop.permute.xlu1 %1013 }
 0x373   : > { %1019 = vrot.lane.b32.xlu1 %v3635_v30, %s3143_s15  ;;  %v1028_v43 = vrot.slane %v1014_v34, %v3641_v41 }
 0x377   : > { %839 = vrot.lane.b32.xlu1 %v3628_v27, %s3141_s10  ;;  %s3001_s10 = scalar_lea.vmem %s3843_s5, 128 }
 0x378   : > { %p3002_p7 = scmp.ne.s32.totalorder %s3843_s5, %s3001_s10 }
 0x37a   : > { %p3003_p13 = pnand %p3002_p7, %p4012_p12 }
 0x37b   : > { %841 = vrot.lane.b32.xlu1 %v3628_v27, %s3142_s2 }
 0x37c   : > { %p3004_p0 = pneg %p3003_p13 }
 0x37f   : > { %1185 = vrot.lane.b32.xlu1 %v1008_v28, %s3144_s4 }
 0x3dd   : > { %v1016_v39 = vpop.permute.xlu1 %1015 }
 0x3de   : > { %v1062_v52 = vrot.slane %v1016_v39, %v3641_v41 }
 0x3e1   : > { %v1018_v42 = vpop.permute.xlu1 %1017 }
 0x3e2   : > { %v1036_v45 = vrot.slane %v1018_v42, %v3641_v41 }
 0x3e4   : > { %v1037_v46 = vcombine.low %v1028_v43, %v1036_v45  ;;  %v1038_v47 = vcombine.high %v1028_v43, %v1036_v45 }
 0x3e5   : > { %v1020_v48 = vpop.permute.xlu1 %1019 }
 0x3e6   : > { %v1045_v49 = vrot.slane %v1037_v46, %v3644_v44  ;;  %v1070_v50 = vrot.slane %v1020_v48, %v3641_v41  ;;  %v1052_v53 = vrot.slane %v1038_v47, %v3644_v44 }
 0x3e8   : > { %v1053_v55 = vcombine.high %v1045_v49, %v3147_v54  ;;  %v1071_v56 = vcombine.low %v1062_v52, %v1070_v50  ;;  %v1072_v57 = vcombine.high %v1062_v52, %v1070_v50  ;;  %v1054_v61 = vcombine.high %v1052_v53, %v3147_v54 }
 0x3e9   : > { %v840_v58 = vpop.permute.xlu1 %839  ;;  %v1093_v62 = vshrl.u32 %v1045_v49, 16  ;;  %v1109_v3 = vshrl.u32 %v1052_v53, 16 }
 0x3ea   : > { %v885_v60 = vrot.slane %v840_v58, %v3641_v41  ;;  %v1079_v63 = vrot.slane %v1071_v56, %v3644_v44  ;;  %v1086_v0 = vrot.slane %v1072_v57, %v3644_v44  ;;  %v1101_v2 = vshrl.u32 %v1053_v55, 16 }
 0x3eb   : > { %v1117_v20 = vshrl.u32 %v1054_v61, 16 }
 0x3ec   : > { %v894_v4 = vcombine.low %v885_v60, %v893_v59  ;;  %v895_v5 = vcombine.high %v885_v60, %v893_v59  ;;  %v1087_v6 = vcombine.high %v1079_v63, %v3147_v54  ;;  %v1088_v7 = vcombine.high %v1086_v0, %v3147_v54 }
 0x3ed   : > { %v1091_v8 = vpack.i.b16 %v1079_v63, %v1045_v49  ;;  %v1094_v10 = vshrl.u32 %v1079_v63, 16  ;;  %v1107_v11 = vpack.i.b16 %v1086_v0, %v1052_v53  ;;  %v1110_v12 = vshrl.u32 %v1086_v0, 16  ;;  %v842_v19 = vpop.permute.xlu1 %841 }
 0x3ee   : > { %v902_v13 = vrot.slane %v894_v4, %v3644_v44  ;;  %v909_v14 = vrot.slane %v895_v5, %v3644_v44  ;;  %v1099_v16 = vpack.i.b16 %v1087_v6, %v1053_v55  ;;  %v1102_v17 = vshrl.u32 %v1087_v6, 16 }
 0x3ef   : > { %v1095_v15 = vpack.i.b16 %v1094_v10, %v1093_v62  ;;  %v1115_v18 = vpack.i.b16 %v1088_v7, %v1054_v61  ;;  %v1111_v21 = vpack.i.b16 %v1110_v12, %v1109_v3  ;;  %v1118_v22 = vshrl.u32 %v1088_v7, 16 }
 0x3f0   : > { %v1103_v23 = vpack.i.b16 %v1102_v17, %v1101_v2  ;;  %v1121_v24 = vcombine.low %v1091_v8, %v1107_v11  ;;  %v859_v28 = vrot.slane %v842_v19, %v3641_v41  ;;  %v910_v31 = vcombine.high %v902_v13, %v3147_v54 }
 0x3f1   : > { %v1119_v25 = vpack.i.b16 %v1118_v22, %v1117_v20  ;;  %v911_v32 = vcombine.high %v909_v14, %v3147_v54  ;;  %v1129_v33 = vcombine.low %v1099_v16, %v1115_v18  ;;  %v1146_v34 = vcombine.low %v1095_v15, %v1111_v21 }
 0x3f2   : > { %v860_v35 = vcombine.low %v851_v26, %v859_v28  ;;  %v861_v36 = vcombine.high %v851_v26, %v859_v28  ;;  %v917_v38 = vshrl.u32 %v902_v13, 16  ;;  %v1128_v39 = vrot.slane %v1121_v24, %v3641_v41 }
 0x3f3   : > { %v1154_v37 = vcombine.low %v1103_v23, %v1119_v25  ;;  %v1136_v40 = vrot.slane %v1129_v33, %v3641_v41  ;;  %v933_v42 = vshrl.u32 %v909_v14, 16  ;;  %v925_v46 = vshrl.u32 %v910_v31, 16 }
 0x3f4   : > { %v868_v43 = vrot.slane %v860_v35, %v3644_v44  ;;  %v875_v27 = vrot.slane %v861_v36, %v3644_v44  ;;  %v941_v47 = vshrl.u32 %v911_v32, 16  ;;  %v1153_v49 = vrot.slane %v1146_v34, %v3641_v41 }
 0x3f5   : > { %v1161_v45 = vrot.slane %v1154_v37, %v3641_v41  ;;  %v1137_v48 = vcombine.low %v1128_v39, %v1136_v40 }
 0x3f6   : > { %v876_v50 = vcombine.high %v868_v43, %v3147_v54  ;;  %v877_v51 = vcombine.high %v875_v27, %v3147_v54  ;;  %v914_v52 = vpack.i.b16 %v902_v13, %v868_v43  ;;  %v916_v53 = vshrl.u32 %v868_v43, 16 }
 0x3f7   : > { %v930_v55 = vpack.i.b16 %v909_v14, %v875_v27  ;;  %v932_v56 = vshrl.u32 %v875_v27, 16  ;;  %v1144_v57 = vrot.slane %v1137_v48, %v3644_v44  ;;  %v1162_v58 = vcombine.low %v1153_v49, %v1161_v45 }
 0x3f8   : > { %v918_v59 = vpack.i.b16 %v917_v38, %v916_v53  ;;  %v922_v60 = vpack.i.b16 %v910_v31, %v876_v50  ;;  %v924_v61 = vshrl.u32 %v876_v50, 16  ;;  %v938_v62 = vpack.i.b16 %v911_v32, %v877_v51 }
 0x3f9   : > { %v934_v63 = vpack.i.b16 %v933_v42, %v932_v56  ;;  %v940_v0 = vshrl.u32 %v877_v51, 16  ;;  %v944_v2 = vcombine.low %v914_v52, %v930_v55  ;;  %v1169_v3 = vrot.slane %v1162_v58, %v3644_v44 }
 0x3fa   : > { %v926_v4 = vpack.i.b16 %v925_v46, %v924_v61  ;;  %v952_v5 = vcombine.low %v922_v60, %v938_v62  ;;  %v1174_v12 = vshrl.u32 %v1144_v57, 16  ;;  %v1145_v21 = vcombine.high %v1144_v57, %v3147_v54 }
 0x3fb   : > { %v942_v6 = vpack.i.b16 %v941_v47, %v940_v0  ;;  %v969_v7 = vcombine.low %v918_v59, %v934_v63  ;;  %v1173_v8 = vpack.i.b16 %v1169_v3, %v1144_v57  ;;  %v951_v10 = vrot.slane %v944_v2, %v3641_v41 }
 0x3fc   : > { %v959_v11 = vrot.slane %v952_v5, %v3641_v41  ;;  %v1175_v13 = vshrl.u32 %v1169_v3, 16  ;;  %v1170_v16 = vcombine.high %v1169_v3, %v3147_v54  ;;  %v1180_v31 = vshrl.u32 %v1145_v21, 16  ;;  %v1184_v5 = vpop.permute.xlu0 %1183 }
 0x3fd   : > { %v977_v14 = vcombine.low %v926_v4, %v942_v6  ;;  %v1358_v15 = vsel %vm1353_vm3, %v1173_v8, 0  ;;  %v976_v19 = vrot.slane %v969_v7, %v3641_v41  ;;  %v1186_v4 = vpop.permute.xlu1 %1185 }
 0x3fe   : > { %2601 = vmatpush3.bf16.xpose.msra.mxu1 %v1358_v15  ;;  %v1176_v17 = vpack.i.b16 %v1175_v13, %v1174_v12  ;;  %v960_v18 = vcombine.low %v951_v10, %v959_v11  ;;  %v1181_v25 = vshrl.u32 %v1170_v16, 16  ;;  %v1179_v28 = vpack.i.b16 %v1170_v16, %v1145_v21 }
 0x3ff   : > { %v984_v20 = vrot.slane %v977_v14, %v3641_v41  ;;  %2612 = vmatprep.subr.bf16.mxu1 %v3138_v9  ;;  %v1198_v11 = vrot.slane %v1184_v5, %v3641_v41  ;;  %v1232_v15 = vrot.slane %v1186_v4, %v3641_v41 }
 0x400   : > { %v1404_v22 = vsel %vm1353_vm3, %v1176_v17, 0  ;;  %v967_v23 = vrot.slane %v960_v18, %v3644_v44  ;;  %v1182_v35 = vpack.i.b16 %v1181_v25, %v1180_v31  ;;  %v1450_v36 = vsel %vm1353_vm3, %v1179_v28, 0 }
 0x401   : > { %2607 = vmatpush3.bf16.xpose.msra.mxu0 %v1404_v22  ;;  %v985_v24 = vcombine.low %v976_v19, %v984_v20 }
 0x402   : > { %2618 = vmatprep.subr.bf16.mxu0 %v3138_v9  ;;  %v997_v33 = vshrl.u32 %v967_v23, 16  ;;  %v1496_v39 = vsel %vm1353_vm3, %v1182_v35, 0  ;;  %v968_v40 = vcombine.high %v967_v23, %v3147_v54 }
 0x403   : > { %v992_v26 = vrot.slane %v985_v24, %v3644_v44 }
 0x404   : > { %v1003_v27 = vshrl.u32 %v968_v40, 16 }
 0x405   : > { %v996_v32 = vpack.i.b16 %v992_v26, %v967_v23  ;;  %v998_v34 = vshrl.u32 %v992_v26, 16  ;;  %v993_v38 = vcombine.high %v992_v26, %v3147_v54 }
 0x407   : > { %2603 = vmatmul.mubr.msk.bf16.vlgmr.msra.gmra.mrb[0].mxu1 %vm1353_vm3, %v996_v32  ;;  %v999_v37 = vpack.i.b16 %v998_v34, %v997_v33  ;;  %v1004_v42 = vshrl.u32 %v993_v38, 16  ;;  %v1002_v43 = vpack.i.b16 %v993_v38, %v968_v40 }
 0x408   : > { %2613 = vmatpush3.bf16.xpose.msra.mxu1 %v1450_v36  ;;  %2614 = vmatprep.mubr.msk.bf16.mxu1 %vm3139_vm2, %v3138_v9 }
 0x409   : > { %2609 = vmatmul.mubr.msk.bf16.vlgmr.msra.gmra.mrb[4].mxu0 %vm1353_vm3, %v999_v37  ;;  %2624 = vmatprep.subr.bf16.mxu1 %v3138_v9  ;;  %v1005_v45 = vpack.i.b16 %v1004_v42, %v1003_v27 }
 0x40a   : > { %2619 = vmatpush3.bf16.xpose.msra.mxu0 %v1496_v39  ;;  %2620 = vmatprep.mubr.msk.bf16.mxu0 %vm3139_vm2, %v3138_v9 }
 0x40b   : > { %2630 = vmatprep.subr.bf16.mxu0 %v3138_v9 }
 0x40f   : > { %2615 = vmatmul.mubr.msk.bf16.vlgmr.msra.gmra.mrb[4].mxu1 %vm1353_vm3, %v1002_v43 }
 0x410   : > { %2626 = vmatprep.mubr.msk.bf16.mxu1 %vm3139_vm2, %v3138_v9 }
 0x411   : > { %2621 = vmatmul.mubr.msk.bf16.vlgmr.msra.gmra.mrb[8].mxu0 %vm1353_vm3, %v1005_v45 }
 0x412   : > { %2632 = vmatprep.mubr.msk.bf16.mxu0 %vm3139_vm2, %v3138_v9 }
 0x4da   : > { %v1394_v46 = vpop.f32.mrb[0].mxu1 }
 0x4db   : > { %v2604_v47 = vpop.f32.mrb[1].mxu1  ;;  %v1538_v48 = vsel %vm1353_vm3, %v1394_v46, -inf }
 0x4dc   : > { %1539 = vmax.xlane.f32.xlu1 %v1538_v48  ;;  %v1397_v49 = vpop.f32.mrb[2].mxu1  ;;  %v1440_v50 = vpop.f32.mrb[4].mxu0 }
 0x4dd   : > { %v2605_v51 = vpop.f32.mrb[3].mxu1  ;;  %v2610_v52 = vpop.f32.mrb[5].mxu0  ;;  %v1541_v53 = vsel %vm1353_vm3, %v1440_v50, -inf }
 0x4de   : > { %1542 = vmax.xlane.f32.xlu0 %v1541_v53  ;;  %v1443_v55 = vpop.f32.mrb[6].mxu0 }
 0x4df   : > { %v2611_v56 = vpop.f32.mrb[7].mxu0 }
 0x4e2   : > { %v3708_v57 = vpop.f32.mrb[4].mxu1 }
 0x4e3   : > { %v2616_v58 = vpop.f32.mrb[5].mxu1  ;;  %v1544_v2 = vsel %vm1353_vm3, %v3708_v57, -inf }
 0x4e4   : > { %v1489_v59 = vpop.f32.mrb[6].mxu1  ;;  %v3710_v60 = vpop.f32.mrb[8].mxu0 }
 0x4e5   : > { %v2617_v61 = vpop.f32.mrb[7].mxu1  ;;  %v2622_v62 = vpop.f32.mrb[9].mxu0  ;;  %v1547_v3 = vsel %vm1353_vm3, %v3710_v60, -inf }
 0x4e6   : > { %v1535_v63 = vpop.f32.mrb[10].mxu0 }
 0x4e7   : > { %v2623_v0 = vpop.f32.mrb[11].mxu0 }
 0x4ed   : > { %1187 = vrot.lane.b32.xlu1 %v3632_v29, %s3144_s4 }
 0x4f4   : > { %1189 = vrot.lane.b32.xlu0 %v3635_v30, %s3144_s4 }
 0x511   : > { %1545 = vmax.xlane.f32.xlu1 %v1544_v2 }
 0x513   : > { %1548 = vmax.xlane.f32.xlu0 %v1547_v3 }
 0x569   : > { %v3720_v6 = vpop.xlane.xlu1 %1539 }
 0x56a   : > { %v1562_v7 = vsub.f32 %v1394_v46, %v3720_v6 }
 0x56b   : > { %v3723_v8 = vpop.xlane.xlu0 %1542 }
 0x56c   : > { %v1566_v29 = vmul.f32 1.442695, %v1562_v7  ;;  %v1563_v10 = vsub.f32 %v1440_v50, %v3723_v8 }
 0x56d   : > { %v1188_v30 = vpop.permute.xlu1 %1187 }
 0x56e   : > { %v1568_v12 = vmul.f32 1.442695, %v1563_v10  ;;  %v1206_v13 = vrot.slane %v1188_v30, %v3641_v41  ;;  %2823 = vpow2.f32 %v1566_v29 }
 0x56f   : > { %v1190_v14 = vpop.permute.xlu0 %1189 }
 0x570   : > { %v1207_v16 = vcombine.low %v1198_v11, %v1206_v13  ;;  %v1208_v17 = vcombine.high %v1198_v11, %v1206_v13  ;;  %v1240_v18 = vrot.slane %v1190_v14, %v3641_v41  ;;  %2825 = vpow2.f32 %v1568_v12 }
 0x572   : > { %v1215_v19 = vrot.slane %v1207_v16, %v3644_v44  ;;  %v1222_v20 = vrot.slane %v1208_v17, %v3644_v44  ;;  %v1241_v21 = vcombine.low %v1232_v15, %v1240_v18  ;;  %v1242_v22 = vcombine.high %v1232_v15, %v1240_v18 }
 0x574   : > { %v1223_v23 = vcombine.high %v1215_v19, %v3147_v54  ;;  %v1224_v24 = vcombine.high %v1222_v20, %v3147_v54  ;;  %v1249_v25 = vrot.slane %v1241_v21, %v3644_v44  ;;  %v1256_v26 = vrot.slane %v1242_v22, %v3644_v44 }
 0x575   : > { %v1263_v28 = vshrl.u32 %v1215_v19, 16  ;;  %v1279_v31 = vshrl.u32 %v1222_v20, 16 }
 0x576   : > { %v1257_v32 = vcombine.high %v1249_v25, %v3147_v54  ;;  %v1258_v33 = vcombine.high %v1256_v26, %v3147_v54  ;;  %v1261_v34 = vpack.i.b16 %v1249_v25, %v1215_v19  ;;  %v1264_v35 = vshrl.u32 %v1249_v25, 16 }
 0x577   : > { %v1271_v36 = vshrl.u32 %v1223_v23, 16  ;;  %v1287_v37 = vshrl.u32 %v1224_v24, 16  ;;  %v1277_v38 = vpack.i.b16 %v1256_v26, %v1222_v20  ;;  %v1280_v39 = vshrl.u32 %v1256_v26, 16 }
 0x578   : > { %v2824_v40 = vpop.eup %2823  ;;  %v1265_v42 = vpack.i.b16 %v1264_v35, %v1263_v28  ;;  %v1269_v43 = vpack.i.b16 %v1257_v32, %v1223_v23  ;;  %v1272_v27 = vshrl.u32 %v1257_v32, 16  ;;  %v1285_v45 = vpack.i.b16 %v1258_v33, %v1224_v24 }
 0x579   : > { %v1281_v46 = vpack.i.b16 %v1280_v39, %v1279_v31  ;;  %v1288_v47 = vshrl.u32 %v1258_v33, 16  ;;  %v1291_v48 = vcombine.low %v1261_v34, %v1277_v38  ;;  %v1578_v49 = vsel %vm1353_vm3, %v2824_v40, 0.0 }
 0x57a   : > { %v2826_v50 = vpop.eup %2825  ;;  %v1273_v51 = vpack.i.b16 %v1272_v27, %v1271_v36  ;;  %v1299_v52 = vcombine.low %v1269_v43, %v1285_v45  ;;  %1579 = vadd.xlane.f32.xlu0 %v1578_v49  ;;  %v1594_v17 = vpack.c.bf16 %v2824_v40, %v2824_v40 }
 0x57b   : > { %v1289_v53 = vpack.i.b16 %v1288_v47, %v1287_v37  ;;  %v1316_v55 = vcombine.low %v1265_v42, %v1281_v46  ;;  %v1581_v56 = vsel %vm1353_vm3, %v2826_v50, 0.0  ;;  %v1298_v58 = vrot.slane %v1291_v48, %v3641_v41 }
 0x57c   : > { %1582 = vadd.xlane.f32.xlu1 %v1581_v56  ;;  %v1306_v59 = vrot.slane %v1299_v52, %v3641_v41  ;;  %v1595_v20 = vpack.c.bf16 %v2826_v50, %v2826_v50  ;;  %v1551_v37 = vsub.f32 -inf, %v3723_v8 }
 0x57d   : > { %v1324_v61 = vcombine.low %v1273_v51, %v1289_v53  ;;  %v1323_v63 = vrot.slane %v1316_v55, %v3641_v41 }
 0x57e   : > { %v1307_v62 = vcombine.low %v1298_v58, %v1306_v59  ;;  %v1556_v39 = vmul.f32 1.442695, %v1551_v37 }
 0x57f   : > { %v1331_v0 = vrot.slane %v1324_v61, %v3641_v41 }
 0x580   : > { %v1314_v2 = vrot.slane %v1307_v62, %v3644_v44 }
 0x581   : > { %v1332_v3 = vcombine.low %v1323_v63, %v1331_v0 }
 0x582   : > { %v1315_v4 = vcombine.high %v1314_v2, %v3147_v54  ;;  %v1344_v29 = vshrl.u32 %v1314_v2, 16 }
 0x583   : > { %v1339_v5 = vrot.slane %v1332_v3, %v3644_v44 }
 0x584   : > { %v1350_v11 = vshrl.u32 %v1315_v4, 16 }
 0x585   : > { %v1343_v7 = vpack.i.b16 %v1339_v5, %v1314_v2  ;;  %v1345_v10 = vshrl.u32 %v1339_v5, 16  ;;  %v1340_v30 = vcombine.high %v1339_v5, %v3147_v54 }
 0x587   : > { %v1603_v12 = vsel %vm1601_vm4, %v1343_v7, 0  ;;  %v1346_v13 = vpack.i.b16 %v1345_v10, %v1344_v29  ;;  %v1349_v14 = vpack.i.b16 %v1340_v30, %v1315_v4  ;;  %v1351_v15 = vshrl.u32 %v1340_v30, 16 }
 0x588   : > { %2625 = vmatpush3.bf16.msra.mxu1 %v1603_v12 }
 0x589   : > { %v1649_v16 = vsel %vm1601_vm4, %v1346_v13, 0  ;;  %2636 = vmatprep.subr.bf16.mxu1 %v3138_v9  ;;  %v1352_v18 = vpack.i.b16 %v1351_v15, %v1350_v11  ;;  %v1695_v19 = vsel %vm1601_vm4, %v1349_v14, 0 }
 0x58a   : > { %2631 = vmatpush3.bf16.msra.mxu0 %v1649_v16 }
 0x58b   : > { %2627 = vmatmul.mubr.msk.bf16.vlgmr.msra.gmra.mrb[8].mxu1 %vm1353_vm3, %v1594_v17  ;;  %2642 = vmatprep.subr.bf16.mxu0 %v3138_v9  ;;  %v1741_v21 = vsel %vm1601_vm4, %v1352_v18, 0 }
 0x58c   : > { %2637 = vmatpush3.bf16.msra.mxu1 %v1695_v19  ;;  %2638 = vmatprep.mubr.msk.bf16.mxu1 %vm3139_vm2, %v3138_v9 }
 0x58d   : > { %2633 = vmatmul.mubr.msk.bf16.vlgmr.msra.gmra.mrb[12].mxu0 %vm1353_vm3, %v1595_v20  ;;  %2648 = vmatprep.subr.bf16.mxu1 %v3138_v9 }
 0x58e   : > { %2643 = vmatpush3.bf16.msra.mxu0 %v1741_v21  ;;  %2644 = vmatprep.mubr.msk.bf16.mxu0 %vm3139_vm2, %v3138_v9 }
 0x58f   : > { %2656 = vmatprep.subr.bf16.mxu0 %v3138_v9 }
 0x59e   : > { %v1546_v22 = vpop.xlane.xlu1 %1545 }
 0x59f   : > { %v1564_v23 = vsub.f32 %v3708_v57, %v1546_v22  ;;  %v2813_v57 = vld [vmem:[%s3580_s14] sm:$0xff]   ;;  %v1552_v52 = vsub.f32 -inf, %v1546_v22 }
 0x5a0   : > { %v1549_v24 = vpop.xlane.xlu0 %1548 }
 0x5a1   : > { %v1570_v25 = vmul.f32 1.442695, %v1564_v23  ;;  %v1565_v26 = vsub.f32 %v3710_v60, %v1549_v24  ;;  %v1550_v60 = vsub.f32 -inf, %v3720_v6  ;;  %v1553_v62 = vsub.f32 -inf, %v1549_v24 }
 0x5a2   : > { %v1558_v3 = vmul.f32 1.442695, %v1552_v52 }
 0x5a3   : > { %v1572_v28 = vmul.f32 1.442695, %v1565_v26  ;;  %2827 = vpow2.f32 %v1570_v25  ;;  %v1554_v38 = vmul.f32 1.442695, %v1550_v60  ;;  %v1560_v4 = vmul.f32 1.442695, %v1553_v62 }
 0x5a5   : > { %2829 = vpow2.f32 %v1572_v28 }
 0x5a6   : > { %2831 = vpow2.f32 %v1554_v38 }
 0x5a7   : > { %2833 = vpow2.f32 %v1556_v39 }
 0x5ad   : > { %v2828_v31 = vpop.eup %2827 }
 0x5ae   : > { %v1584_v32 = vsel %vm1353_vm3, %v2828_v31, 0.0  ;;  %v1596_v33 = vpack.c.bf16 %v2828_v31, %v2828_v31 }
 0x5af   : > { %v2830_v34 = vpop.eup %2829  ;;  %1585 = vadd.xlane.f32.xlu0 %v1584_v32 }
 0x5b0   : > { %2639 = vmatmul.mubr.msk.bf16.vlgmr.msra.gmra.mrb[12].mxu1 %vm1353_vm3, %v1596_v33  ;;  %v1587_v35 = vsel %vm1353_vm3, %v2830_v34, 0.0  ;;  %v1597_v36 = vpack.c.bf16 %v2830_v34, %v2830_v34  ;;  %v2832_v40 = vpop.eup %2831 }
 0x5b1   : > { %1588 = vadd.xlane.f32.xlu1 %v1587_v35  ;;  %2652 = vmatprep.mubr.msk.bf16.mxu1 %vm3139_vm2, %v3138_v9  ;;  %v2834_v42 = vpop.eup %2833  ;;  %v1574_v27 = vmul.f32 0.0, %v2832_v40 }
 0x5b2   : > { %2645 = vmatmul.mubr.msk.bf16.vlgmr.msra.gmra.mrb[16].mxu0 %vm1353_vm3, %v1597_v36  ;;  %2649 = vmatpush3.bf16.msra.mxu1 %v2813_v57  ;;  %v1575_v47 = vmul.f32 0.0, %v2834_v42 }
 0x5b3   : > { %2660 = vmatprep.mubr.msk.bf16.mxu0 %vm3139_vm2, %v3138_v9  ;;  %2650 = vmatprep.subr.bf16.mxu1 %v3138_v9 }
 0x607   : > { %v1580_v43 = vpop.xlane.xlu0 %1579 }
 0x608   : > { %v1590_v46 = vadd.f32 %v1580_v43, %v1574_v27 }
 0x609   : > { %v1583_v45 = vpop.xlane.xlu1 %1582 }
 0x60a   : > { %v1591_v48 = vadd.f32 %v1583_v45, %v1575_v47  ;;  %2835 = vrcp.f32 %v1590_v46 }
 0x60c   : > { %2837 = vrcp.f32 %v1591_v48 }
 0x60d   : > { %2839 = vpow2.f32 %v1558_v3 }
 0x60e   : > { %2841 = vpow2.f32 %v1560_v4 }
 0x614   : > { %v2836_v6 = vpop.eup %2835 }
 0x616   : > { %v2838_v61 = vpop.eup %2837 }
 0x617   : > { %v2840_v5 = vpop.eup %2839 }
 0x618   : > { %v2842_v7 = vpop.eup %2841  ;;  %v1576_v10 = vmul.f32 0.0, %v2840_v5 }
 0x619   : > { %v1577_v12 = vmul.f32 0.0, %v2842_v7 }
 0x63c   : > { %v1586_v29 = vpop.xlane.xlu0 %1585 }
 0x63d   : > { %v1592_v11 = vadd.f32 %v1586_v29, %v1576_v10 }
 0x63e   : > { %v1589_v30 = vpop.xlane.xlu1 %1588 }
 0x63f   : > { %v1593_v13 = vadd.f32 %v1589_v30, %v1577_v12  ;;  %2843 = vrcp.f32 %v1592_v11  ;;  %v2814_v30 = vld [vmem:[%s3580_s14 + $0x8] sm:$0xff]   ;;  %s3148_s14 = smov 8  }
 0x640   : > { %2651 = vmatpush3.bf16.msra.mxu1 %v2814_v30 }
 0x641   : > { %2845 = vrcp.f32 %v1593_v13  ;;  %2664 = vmatprep.subr.bf16.mxu1 %v3138_v9 }
 0x649   : > { %v2844_v17 = vpop.eup %2843 }
 0x64b   : > { %v2846_v25 = vpop.eup %2845 }
 0x65e   : > { %v1639_v49 = vpop.f32.mrb[8].mxu1 }
 0x65f   : > { %v1783_v50 = vadd.f32 %v1639_v49, %v1574_v27  ;;  %v2628_v51 = vpop.f32.mrb[9].mxu1 }
 0x660   : > { %v1642_v8 = vpop.f32.mrb[10].mxu1  ;;  %v1685_v53 = vpop.f32.mrb[12].mxu0 }
 0x661   : > { %v1791_v55 = vmul.f32 %v2836_v6, %v1783_v50  ;;  %v1784_v56 = vadd.f32 %v1685_v53, %v1575_v47  ;;  %v2629_v58 = vpop.f32.mrb[11].mxu1  ;;  %v2634_v59 = vpop.f32.mrb[13].mxu0 }
 0x662   : > { %v1688_v63 = vpop.f32.mrb[14].mxu0 }
 0x663   : > { %v1792_v0 = vmul.f32 %v2838_v61, %v1784_v56  ;;  %v2635_v2 = vpop.f32.mrb[15].mxu0  ;;  %v1795_v20 = vpack.c.bf16 %v1791_v55, %v1791_v55 }
 0x665   : > { %v1829_v28 = vpack.c.bf16 %v1792_v0, %v1792_v0  ;;  %v1802_v34 = vrot.slane %v1795_v20, %v3641_v41 }
 0x667   : > { %v1836_v57 = vrot.slane %v1829_v28, %v3641_v41 }
 0x683   : > { %v1731_v14 = vpop.f32.mrb[12].mxu1 }
 0x684   : > { %v1785_v15 = vadd.f32 %v1731_v14, %v1576_v10  ;;  %v2640_v16 = vpop.f32.mrb[13].mxu1 }
 0x685   : > { %v1734_v18 = vpop.f32.mrb[14].mxu1  ;;  %v1777_v19 = vpop.f32.mrb[16].mxu0 }
 0x686   : > { %v1793_v21 = vmul.f32 %v2844_v17, %v1785_v15  ;;  %v1786_v22 = vadd.f32 %v1777_v19, %v1577_v12  ;;  %v2641_v23 = vpop.f32.mrb[15].mxu1  ;;  %v2646_v24 = vpop.f32.mrb[17].mxu0 }
 0x687   : > { %v1780_v26 = vpop.f32.mrb[18].mxu0 }
 0x688   : > { %v1803_v31 = vpack.c.bf16 %v1793_v21, %v1793_v21  ;;  %v1794_v32 = vmul.f32 %v2846_v25, %v1786_v22  ;;  %v2647_v33 = vpop.f32.mrb[19].mxu0 }
 0x68a   : > { %v1810_v35 = vrot.slane %v1803_v31, %v3641_v41  ;;  %v1837_v36 = vpack.c.bf16 %v1794_v32, %v1794_v32 }
 0x68c   : > { %v1811_v60 = vcombine.low %v1802_v34, %v1810_v35  ;;  %v1812_v37 = vcombine.high %v1802_v34, %v1810_v35  ;;  %v1844_v38 = vrot.slane %v1837_v36, %v3641_v41  ;;  %v2537_v34 = vld [vmem:[%s4005_s17] ss:$0 sm:$0xff] }
 0x68e   : > { %v1819_v39 = vrot.slane %v1811_v60, %v3644_v44  ;;  %v1826_v40 = vrot.slane %v1812_v37, %v3644_v44  ;;  %v1845_v42 = vcombine.low %v1836_v57, %v1844_v38  ;;  %v1846_v43 = vcombine.high %v1836_v57, %v1844_v38 }
 0x690   : > { %v1827_v27 = vcombine.high %v1819_v39, %v3147_v54  ;;  %v1853_v45 = vrot.slane %v1845_v42, %v3644_v44  ;;  %v1860_v46 = vrot.slane %v1846_v43, %v3644_v44  ;;  %v1828_v47 = vcombine.high %v1826_v40, %v3147_v54 }
 0x691   : > { %v1867_v48 = vshrl.u32 %v1819_v39, 16  ;;  %v1883_v8 = vshrl.u32 %v1826_v40, 16 }
 0x692   : > { %v1861_v49 = vcombine.high %v1853_v45, %v3147_v54  ;;  %v1862_v50 = vcombine.high %v1860_v46, %v3147_v54  ;;  %v1865_v51 = vpack.i.b16 %v1853_v45, %v1819_v39  ;;  %v1868_v6 = vshrl.u32 %v1853_v45, 16 }
 0x693   : > { %v1875_v52 = vshrl.u32 %v1827_v27, 16  ;;  %v1881_v53 = vpack.i.b16 %v1860_v46, %v1826_v40  ;;  %v1884_v55 = vshrl.u32 %v1860_v46, 16  ;;  %v1891_v62 = vshrl.u32 %v1828_v47, 16  ;;  %v2815_v46 = vld [vmem:[%s3585_s6] sm:$0xff]  }
 0x694   : > { %v1869_v56 = vpack.i.b16 %v1868_v6, %v1867_v48  ;;  %v1873_v58 = vpack.i.b16 %v1861_v49, %v1827_v27  ;;  %v1876_v59 = vshrl.u32 %v1861_v49, 16  ;;  %v1889_v61 = vpack.i.b16 %v1862_v50, %v1828_v47  ;;  %2657 = vmatpush3.bf16.msra.mxu0 %v2815_v46  ;;  %v2816_v47 = vld [vmem:[%s3585_s6 + $0x8] sm:$0xff]   ;;  %s4008_s6 = sld [smem:[#allocation20_spill]] }
 0x695   : > { %v1885_v63 = vpack.i.b16 %v1884_v55, %v1883_v8  ;;  %v1892_v0 = vshrl.u32 %v1862_v50, 16  ;;  %v1895_v2 = vcombine.low %v1865_v51, %v1881_v53  ;;  %2658 = vmatprep.subr.bf16.mxu0 %v3138_v9  ;;  %v2541_v51 = vld [vmem:[%s4006_s27] ss:$0 sm:$0xff] }
 0x696   : > { %v1877_v3 = vpack.i.b16 %v1876_v59, %v1875_v52  ;;  %v1903_v4 = vcombine.low %v1873_v58, %v1889_v61  ;;  %v2542_v52 = vld [vmem:[%s4007_s9] ss:$0 sm:$0xff]  ;;  %v2818_v59 = vld [vmem:[%s3590_s20 + $0x8] sm:$0xff]   ;;  %v2819_v61 = vld [vmem:[%s3590_s20 + $0x10] sm:$0xff]  }
 0x697   : > { %v1893_v5 = vpack.i.b16 %v1892_v0, %v1891_v62  ;;  %v1920_v7 = vcombine.low %v1869_v56, %v1885_v63  ;;  %v1902_v29 = vrot.slane %v1895_v2, %v3641_v41  ;;  %v2817_v58 = vld [vmem:[%s3590_s20] sm:$0xff]   ;;  %v2820_v62 = vld [vmem:[%s3590_s20 + $0x18] sm:$0xff]  }
 0x698   : > { %v1910_v10 = vrot.slane %v1903_v4, %v3641_v41  ;;  %2659 = vmatpush3.bf16.msra.mxu0 %v2816_v47  ;;  %v2543_v63 = vld [vmem:[%s600_s12] ss:$0 sm:$0xff] }
 0x699   : > { %v1928_v11 = vcombine.low %v1877_v3, %v1893_v5  ;;  %v1927_v13 = vrot.slane %v1920_v7, %v3641_v41 }
 0x69a   : > { %v1911_v12 = vcombine.low %v1902_v29, %v1910_v10  ;;  %s2554_s26 = sshll.u32 %s4008_s6, 7 }
 0x69b   : > { %v1935_v14 = vrot.slane %v1928_v11, %v3641_v41  ;;  %s3841_s11 = scalar_lea.hbm %s4010_s30, %s2554_s26 }
 0x69c   : > { %v1918_v15 = vrot.slane %v1911_v12, %v3644_v44 }
 0x69d   : > { %v1936_v16 = vcombine.low %v1927_v13, %v1935_v14 }
 0x69e   : > { %v1919_v18 = vcombine.high %v1918_v15, %v3147_v54  ;;  %v1948_v19 = vshrl.u32 %v1918_v15, 16 }
 0x69f   : > { %v1943_v17 = vrot.slane %v1936_v16, %v3644_v44 }
 0x6a0   : > { %v1954_v25 = vshrl.u32 %v1919_v18, 16 }
 0x6a1   : > { %v1949_v20 = vshrl.u32 %v1943_v17, 16  ;;  %v1944_v21 = vcombine.high %v1943_v17, %v3147_v54  ;;  %v1947_v22 = vpack.i.b16 %v1943_v17, %v1918_v15 }
 0x6a3   : > { %v1950_v23 = vpack.i.b16 %v1949_v20, %v1948_v19  ;;  %v1953_v24 = vpack.i.b16 %v1944_v21, %v1919_v18  ;;  %v1955_v26 = vshrl.u32 %v1944_v21, 16 }
 0x6a5   : > { %1957 = vrot.lane.b32.xlu0 %v1950_v23, %s3148_s14  ;;  %1959 = vrot.lane.b32.xlu1 %v1953_v24, %s3149_s28  ;;  %v1956_v41 = vpack.i.b16 %v1955_v26, %v1954_v25  ;;  %v2552_v24 = vld [vmem:[%s729_s3] ss:$0 sm:$0xff]  ;;  %s3005_s3 = sshll.u32 %s3151_s1, 4  ;;  %s3006_s3 = int_to_ptr.vmem [resolvable:$false] %s3005_s3 }
 0x6a6   : > { %s3007_s2 = scalar_lea.vmem %s3006_s3, 256  ;;  %p3008_p4 = scmp.lt.s32.totalorder %s3843_s5, %s3006_s3 }
 0x6a7   : > { %p3009_p1 = scmp.lt.s32.totalorder %s3007_s2, %s3001_s10 }
 0x6a9   : > { %1961 = vrot.lane.b32.xlu1 %v1956_v41, %s3150_s21  ;;  %p3010_p3 = por %p3009_p1, %p3008_p4 }
 0x6ab   : > { %p3011_p5 = pnand %p3010_p3, %p3004_p0 }
 0x717   : > { %v1958_v44 = vpop.permute.xlu0 %1957  ;;  %v1960_v28 = vpop.permute.xlu1 %1959 }
 0x718   : > { %v1965_v31 = vsel %vm1353_vm3, %v1947_v22, %v1958_v44 }
 0x719   : > { %v1968_v54 = vsel %vm1966_vm5, %v1965_v31, %v1960_v28 }
 0x71b   : > { %v1962_v32 = vpop.permute.xlu1 %1961 }
 0x71c   : > { %v1971_v33 = vsel %vm1969_vm6, %v1968_v54, %v1962_v32 }
 0x71d   : > { %2653 = vmatmul.mubr.msk.bf16.vlgmr.msra.gmra.mrb[16].mxu1 %vm746_vm1, %v1971_v33 }
 0x71e   : > { %2672 = vmatprep.mubr.msk.bf16.mxu1 %vm3139_vm2, %v3138_v9  ;;  %2665 = vmatpush3.bf16.msra.mxu1 %v2817_v58 }
 0x71f   : > { %2666 = vmatprep.subr.bf16.mxu1 %v3138_v9 }
 0x722   : > { %2667 = vmatpush3.bf16.msra.mxu1 %v2818_v59 }
 0x723   : > { %2668 = vmatprep.subr.bf16.mxu1 %v3138_v9 }
 0x726   : > { %2669 = vmatpush3.bf16.msra.mxu1 %v2819_v61 }
 0x727   : > { %2670 = vmatprep.subr.bf16.mxu1 %v3138_v9 }
 0x72a   : > { %2671 = vmatpush3.bf16.msra.mxu1 %v2820_v62 }
 0x7f0   : > { %v2031_v35 = vpop.f32.mrb[16].mxu1 }
 0x7f1   : > { %v2032_v36 = vadd.f32 %v2537_v34, %v2031_v35  ;;  %v2654_v57 = vpop.f32.mrb[17].mxu1 }
 0x7f2   : > { %v2034_v60 = vpop.f32.mrb[18].mxu1 }
 0x7f3   : > { %v2037_v37 = vadd.f32 %v2032_v36, %v3601_v1  ;;  %v2655_v38 = vpop.f32.mrb[19].mxu1 }
 0x7f5   : > { %2038 = vst.msk [vmem:[%s3597_s16] sm:$0xff] %vm746_vm1, %v2037_v37  ;;  %v2041_v39 = vsel %vm746_vm1, %v2037_v37, 0.0 }
 0x7f6   : > { %2042 = vadd.xlane.f32.xlu0 %v2041_v39 }
 0x7fc   : > { %v2226_v19 = vld [vmem:[%s3597_s16] sm:$0xff] }
 0x883   : > { %v2043_v40 = vpop.xlane.xlu0 %2042 }
 0x884   : > { %v2044_v42 = vmul.f32 0.03125, %v2043_v40 }
 0x886   : > { %v2045_v43 = vsub.f32 %v2037_v37, %v2044_v42 }
 0x888   : > { %v2046_v27 = vmul.f32 %v2045_v43, %v2045_v43 }
 0x88a   : > { %v2047_v45 = vsel %vm746_vm1, %v2046_v27, 0.0 }
 0x88b   : > { %2048 = vadd.xlane.f32.xlu1 %v2047_v45 }
 0x918   : > { %v2049_v1 = vpop.xlane.xlu1 %2048 }
 0x919   : > { %v2050_v48 = vmul.f32 0.03125, %v2049_v1 }
 0x91b   : > { %v2051_v49 = vadd.f32 1e-05, %v2050_v48 }
 0x91d   : > { %2847 = vrsqrt.f32 %v2051_v49 }
 0x927   : > { %v2848_v50 = vpop.eup %2847 }
 0x928   : > { %v2053_v6 = vmul.f32 %v2848_v50, %v2045_v43 }
 0x92a   : > { %v2060_v8 = vmul.f32 %v2541_v51, %v2053_v6 }
 0x92c   : > { %v2067_v53 = vadd.f32 %v2542_v52, %v2060_v8 }
 0x92e   : > { %2068 = vst.msk [vmem:[#allocation2] sm:$0xff] %vm746_vm1, %v2067_v53 }
 0x935   : > { %v2069_v55 = vld [vmem:[#allocation2] sm:$0xff] }
 0x936   : > { %v2070_v56 = vpack.c.bf16 %v2069_v55, %v2069_v55 }
 0x938   : > { %2661 = vmatmul.mubr.msk.bf16.vlgmr.msra.gmra.mrb[20].mxu0 %vm746_vm1, %v2070_v56 }
 0xa0b   : > { %v2132_v0 = vpop.f32.mrb[20].mxu0 }
 0xa0c   : > { %v2133_v2 = vadd.f32 %v2543_v63, %v2132_v0  ;;  %v2662_v3 = vpop.f32.mrb[21].mxu0 }
 0xa0d   : > { %v2135_v4 = vpop.f32.mrb[22].mxu0 }
 0xa0e   : > { %v2138_v5 = vmul.f32 0.044715, %v2133_v2  ;;  %v2663_v7 = vpop.f32.mrb[23].mxu0  ;;  %v2145_v14 = vmul.f32 0.5, %v2133_v2 }
 0xa10   : > { %v2139_v29 = vmul.f32 %v2138_v5, %v2133_v2 }
 0xa12   : > { %v2140_v10 = vmul.f32 %v2139_v29, %v2133_v2 }
 0xa14   : > { %v2141_v30 = vadd.f32 %v2140_v10, %v2133_v2 }
 0xa16   : > { %v2142_v11 = vmul.f32 0.7978846, %v2141_v30 }
 0xa18   : > { %v2143_v12 = vpack.c.bf16 %v2142_v11, %v2142_v11 }
 0xa1a   : > { %2849 = vtanh.bf16 %v2143_v12 }
 0xa25   : > { %v2850_v13 = vpop.eup %2849 }
 0xa26   : > { %v2146_v9 = vunpack.c.l.bf16 %v2850_v13 }
 0xa28   : > { %v2147_v15 = vadd.f32 1.0, %v2146_v9 }
 0xa2a   : > { %v2148_v16 = vmul.f32 %v2147_v15, %v2145_v14 }
 0xa2c   : > { %v2149_v17 = vpack.c.bf16 %v2148_v16, %v2148_v16 }
 0xa2e   : > { %2673 = vmatmul.mubr.msk.bf16.vlgmr.msra.gmra.mrb[20].mxu1 %vm2182_vm7, %v2149_v17 }
 0xb01   : > { %v2220_v18 = vpop.f32.mrb[20].mxu1 }
 0xb02   : > { %v2227_v20 = vadd.f32 %v2226_v19, %v2220_v18  ;;  %v2674_v21 = vpop.f32.mrb[21].mxu1 }
 0xb03   : > { %v2223_v22 = vpop.f32.mrb[22].mxu1 }
 0xb04   : > { %2228 = vst.msk [vmem:[%s3597_s16] sm:$0xff] %vm746_vm1, %v2227_v20  ;;  %v2675_v23 = vpop.f32.mrb[23].mxu1 }
 0xb0b   : > { %v2232_v25 = vld [vmem:[%s3597_s16] sm:$0xff] }
 0xb0c   : > { %v2240_v26 = vadd.f32 %v2552_v24, %v2232_v25 }
 0xb0e   : > { %2241 = vst.msk [vmem:[%s3597_s16] sm:$0xff] %vm746_vm1, %v2240_v26 }
 0xb0f   : > { %3014 = shalt.err (!%p3011_p5)
}
 0xb10   : > { %s3015_s29 = scalar_lea.hbm %s3841_s11, 128  ;;  %s3019_s4 = scalar_lea.hbm %s4011_s19, 256 }
 0xb11   : > { %p3016_p10 = scmp.ne.s32.totalorder %s3841_s11, %s3015_s29  ;;  %p3020_p9 = scmp.lt.u32.totalorder %s3841_s11, %s4011_s19 }
 0xb12   : > { %p3021_p2 = scmp.lt.u32.totalorder %s3019_s4, %s3015_s29  ;;  %p3023_p7 = scmp.lt.u32.totalorder %s3015_s29, %s3841_s11 }
 0xb13   : > { %p3017_p8 = pnand %p3016_p10, %p4012_p12 }
 0xb14   : > { %p3022_p6 = por %p3021_p2, %p3020_p9 }
 0xb15   : > { %p3018_p11 = pneg %p3017_p8 }
 0xb16   : > { %p3024_p13 = por %p3023_p7, %p3022_p6 }
 0xb18   : > { %p3025_p0 = pnand %p3024_p13, %p3018_p11 }
 0xb1a   : > { %3028 = shalt.err (!%p3025_p0)
}
 0xb1b   : > { %2686 = dma.vmem_to_hbm [thread:$0]  (%p4012_p12), %s3843_s5, 128, %s3841_s11, %s2243_s7  }
 0xb1c PF: > { %s4013_s21 = sld [smem:[#allocation28_spill]]  ;;  %p2709_p4 = scmp.ge.s32.totalorder %s3131_s13, 2 }
 0xb1d   : > { %s2268_s17 = sand.u32 1, %s3103_s24  }
 0xb1e   : > { %s2269_s27 = scalar_lea.sflag [#allocation5], %s2268_s17 }
 0xb22   : > { %p4014_p1 = scmp.ne.s32.totalorder %s4013_s21, 0 }
 0xb24   : > { %p2705_p3 = pnand %p2709_p4, %p4014_p1 }
 0xb26   : > { %3086 = dma.done.wait (!%p2705_p3), %s2269_s27, 128  }
 0xb27   : > { %3088 = vsyncadd (!%p2705_p3), %s2269_s27, 4294967168  ;;  %s34_s13 = sadd.s32 1, %s3131_s13   ;;  %s4015_s9 = sld [smem:[#allocation17_spill]] }
 0xb28   : > { %p31_p5 = scmp.ge.s32.totalorder %s34_s13, 6   ;;  %s4016_s23 = sld [smem:[#allocation24_spill]] }
 0xb29   : > { %s4017_s18 = sld [smem:[#allocation18_spill]]  ;;  %s4018_s26 = sld [smem:[#allocation27_spill]] }
 0xb2a   : > { %s4019_s27 = sld [smem:[#allocation21_spill]]  ;;  %s4020_s28 = sld [smem:[#allocation22_spill]] }
 0xb2b   : > { %s4021_s29 = sld [smem:[#allocation23_spill]]  ;;  %s4022_s30 = sld [smem:[#allocation25_spill]] }
 0xb2c   : > { %s4023_s21 = smov %s3095_s22  ;;  %s4025_s24 = smov %s3107_s25 }
 0xb2d   : > { %s4024_s22 = smov %s4015_s9  ;;  %33 = sbr.rel (!%p31_p5) target bundleno = 27 (0x1b), region = 194 }
 0xb2f   : > { %s4026_s25 = smov %s4017_s18 }
 0xb34   :  { %2274 = vsyncpa [#allocation4], 1 }
 0xb35   :  { %2276 = vsyncpa [#allocation4 + $0x1], 1 }
 0xb36   :  { %2277 = vsyncpa [#allocation7], 1 }
 0xb37   :  { %2279 = vsyncpa [#allocation7 + $0x1], 1 }
 0xb38   :  { %2280 = vsyncpa [#allocation10], 1 }
 0xb39   :  { %2282 = vsyncpa [#allocation10 + $0x1], 1 }
 0xb3a   :  { %2283 = vsyncpa [#allocation5], 1 }
 0xb3b   :  { %2285 = vsyncpa [#allocation5 + $0x1], 1 }

</bundles_post_ra>
